<compile_context>
chip_gen: v7x
topology: tpu7x:2x2x1
jax: 0.10.0
libtpu: 0.0.40
codegen_flags: <defaults>
</compile_context>

<pallas_src>
import jax
import jax.numpy as jnp
from jax.experimental import pallas as pl
from jax.experimental.pallas import tpu as pltpu

LANE = 128


def _round_up(n, m):
    return ((n + m - 1) // m) * m


def _pick_batch_tile(B, max_tile=16):
    """Batch tile: whole batch for small B; for large B a divisor that keeps the output
    block's row dim a multiple of 8.  Size max_tile per generation (v7x: 64 MiB VMEM)."""
    if B <= max_tile:
        return B
    for t in range(max_tile, 0, -1):
        if B % t == 0 and (t % 8 == 0 or t == B):
            return t
    return B


def _im2col_valid(x, K):
    """x: (B, H, W, C).  Returns (B*Ho*Wo, K*K*C) with column order (kh, kw, c),
    matching a C-order reshape of an HWIO conv weight (K, K, C, Cout) -> (K*K*C, Cout).
    Built with 2*K lane-axis concatenations so the matmul contraction axis is lane-dense
    (and the concats are plain vreg moves once C is a multiple of 128)."""
    B, H, W, C = x.shape
    Ho, Wo = H - K + 1, W - K + 1
    cols = jnp.concatenate([x[:, :, kw:kw + Wo, :] for kw in range(K)], axis=-1)
    cols = jnp.concatenate([cols[:, kh:kh + Ho, :, :] for kh in range(K)], axis=-1)
    return cols.reshape(B * Ho * Wo, K * K * C)


def _maxpool_2x2(y):
    """2x2 max pool, stride 2.  y: (B, H, W, C) with even H, W."""
    B, H, W, C = y.shape
    y = y.reshape(B, H // 2, 2, W, C)                      # outer-dim split: no relayout
    y = jnp.maximum(y[:, :, 0], y[:, :, 1])                # H-pool (free)
    # W-pool: review suggests pltpu.roll(y, -1, axis=2) + stride-2 select to move the
    # shuffle onto the XLU; kept as reshape+select for lowering safety (tensors are tiny
    # and C is a single 128-lane slab after channel padding).
    y = y.reshape(B, H // 2, W // 2, 2, C)
    y = jnp.maximum(y[:, :, :, 0, :], y[:, :, :, 1, :])    # W-pool
    return y


def _make_fused_kernel(B_tile, Ho1, Wo1, K, num_classes):
    def kernel(cols1_ref, w1_ref, b1_ref, w2_ref, b2_ref,
               w3_ref, b3_ref, w4_ref, b4_ref, o_ref):
        # cols1_ref: (B_tile*Ho1*Wo1, KK1p) bf16   (conv1 im2col, prebuilt in wrapper)
        # w1_ref: (KK1p, C1p) bf16     b1_ref: (1, C1p)  f32
        # w2_ref: (K*K*C1p, C2p) bf16  b2_ref: (1, C2p)  f32
        # w3_ref: (Hs*Ws*C2p, Hp) bf16 b3_ref: (1, Hp)   f32
        # w4_ref: (Hp, NCp) bf16       b4_ref: (1, NCp)  f32
        # o_ref : (B_tile, NCp) f32 log-probabilities (padded class cols hold -inf)
        C1p = w1_ref.shape[1]
        C2p = w2_ref.shape[1]

        # conv1 (5x5 valid) as one im2col matmul -> 2x2 maxpool -> relu.
        # dropout(p=0) after relu is an exact identity (NoDropoutModel semantics).
        y1 = jnp.dot(cols1_ref[...], w1_ref[...],
                     preferred_element_type=jnp.float32) + b1_ref[...]
        y1 = y1.reshape(B_tile, Ho1, Wo1, C1p)
        h1 = jnp.maximum(_maxpool_2x2(y1), 0.0)

        # conv2: cast to bf16 BEFORE im2col (25x less cast work / concat traffic);
        # 128-wide channel slabs make every lane concat 128-aligned.
        cols2 = _im2col_valid(h1.astype(jnp.bfloat16), K)
        y2 = jnp.dot(cols2, w2_ref[...],
                     preferred_element_type=jnp.float32) + b2_ref[...]
        Ho2 = Ho1 // 2 - K + 1
        Wo2 = Wo1 // 2 - K + 1
        y2 = y2.reshape(B_tile, Ho2, Wo2, C2p)
        h2 = jnp.maximum(_maxpool_2x2(y2), 0.0)

        # NHWC flatten.  fc1 weight rows were permuted to NHWC order (and zero-padded)
        # in the wrapper, so no in-kernel transpose regardless of spatial size.
        feat = h2.reshape(B_tile, -1)

        # fc1 -> relu -> [dropout p=0 == identity] -> fc2 -> log_softmax
        h = jnp.dot(feat.astype(jnp.bfloat16), w3_ref[...],
                    preferred_element_type=jnp.float32) + b3_ref[...]
        h = jnp.maximum(h, 0.0)
        logits = jnp.dot(h.astype(jnp.bfloat16), w4_ref[...],
                         preferred_element_type=jnp.float32) + b4_ref[...]

        # Padded class columns (zero weight cols + zero bias) would pollute the softmax
        # sum: mask them to -inf before the stable log_softmax.
        if num_classes < o_ref.shape[1]:
            lane = jax.lax.broadcasted_iota(jnp.int32, logits.shape, 1)
            logits = jnp.where(lane < num_classes, logits, -jnp.inf)
        m = jnp.max(logits, axis=-1, keepdims=True)
        s = logits - m
        lse = jnp.log(jnp.sum(jnp.exp(s), axis=-1, keepdims=True))
        o_ref[...] = (s - lse).astype(o_ref.dtype)

    return kernel


@jax.jit
def no_dropout_model_forward(x_nchw, params):
    """x_nchw: (B, Cin, H, W) f32 (PyTorch layout).  Returns (B, num_classes) log-probs."""
    B, Cin, H, W = x_nchw.shape
    K = params["conv1_w"].shape[0]
    C1 = params["conv1_w"].shape[3]
    C2 = params["conv2_w"].shape[3]
    HID = params["fc1_w"].shape[1]
    NC = params["fc2_w"].shape[1]

    # Trace-time shape sanity for the two 2x2 pools.
    Ho1, Wo1 = H - K + 1, W - K + 1
    assert Ho1 % 2 == 0 and Wo1 % 2 == 0
    Hp1, Wp1 = Ho1 // 2, Wo1 // 2
    Ho2, Wo2 = Hp1 - K + 1, Wp1 - K + 1
    assert Ho2 % 2 == 0 and Wo2 % 2 == 0
    Hs, Ws = Ho2 // 2, Wo2 // 2
    assert params["fc1_w"].shape[0] == C2 * Hs * Ws

    # Lane-aligned (zero-padded) sizes.
    KK1p = _round_up(K * K * Cin, LANE)
    C1p = _round_up(C1, LANE)
    C2p = _round_up(C2, LANE)
    HIDp = _round_up(HID, LANE)
    NCp = _round_up(NC, LANE)

    # conv1 im2col hoisted to the wrapper (a couple of tiny XLA ops): removes the 2K
    # lane-unaligned Cin=4 concats from the kernel.  Cast to bf16 BEFORE im2col.
    x_nhwc = jnp.transpose(x_nchw, (0, 2, 3, 1)).astype(jnp.bfloat16)
    cols1 = _im2col_valid(x_nhwc, K)
    cols1 = jnp.pad(cols1, ((0, 0), (0, KK1p - K * K * Cin)))

    # Zero-pad weights/biases to 128-lane widths (padded producers are exactly zero, so
    # padded consumer rows are zeroed too and results are bit-identical on the real
    # slice).  In production fold this into the checkpoint once instead of per call.
    w1 = jnp.pad(params["conv1_w"], ((0, 0), (0, 0), (0, 0), (0, C1p - C1)))
    w1p = jnp.pad(w1.reshape(K * K * Cin, C1p),
                  ((0, KK1p - K * K * Cin), (0, 0))).astype(jnp.bfloat16)
    b1p = jnp.pad(params["conv1_b"], ((0, 0), (0, C1p - C1)))

    w2 = jnp.pad(params["conv2_w"], ((0, 0), (0, 0), (0, C1p - C1), (0, C2p - C2)))
    w2p = w2.reshape(K * K * C1p, C2p).astype(jnp.bfloat16)
    b2p = jnp.pad(params["conv2_b"], ((0, 0), (0, C2p - C2)))

    # fc1 rows are in PyTorch NCHW-flatten order (c, h, w); permute to NHWC (h, w, c)
    # so the kernel flattens h2 directly, then pad channels / hidden.
    w3 = params["fc1_w"].reshape(C2, Hs, Ws, HID)
    w3 = jnp.transpose(w3, (1, 2, 0, 3))
    w3 = jnp.pad(w3, ((0, 0), (0, 0), (0, C2p - C2), (0, HIDp - HID)))
    w3p = w3.reshape(Hs * Ws * C2p, HIDp).astype(jnp.bfloat16)
    b3p = jnp.pad(params["fc1_b"], ((0, 0), (0, HIDp - HID)))

    w4p = jnp.pad(params["fc2_w"], ((0, HIDp - HID), (0, NCp - NC))).astype(jnp.bfloat16)
    b4p = jnp.pad(params["fc2_b"], ((0, 0), (0, NCp - NC)))

    R1 = Ho1 * Wo1
    B_tile = _pick_batch_tile(B)
    grid = (B // B_tile,)

    # TODO(synk): set_dropout_p(0)/set_dropout_p(DROPOUT_PROB) is stateful nn.Module
    # bookkeeping; with p=0 every dropout layer is an exact identity, nothing to emit.
    out_padded = pl.pallas_call(
        _make_fused_kernel(B_tile, Ho1, Wo1, K, NC),
        out_shape=jax.ShapeDtypeStruct((B, NCp), jnp.float32),
        grid=grid,
        in_specs=[
            # Batch-tiled im2col rows (144 rows/item keeps any tile a multiple of 8).
            pl.BlockSpec((B_tile * R1, KK1p), lambda i: (i, 0)),
            # Weights/biases: constant index_map -> DMA'd once, VMEM-resident.
            pl.BlockSpec((KK1p, C1p), lambda i: (0, 0)),
            pl.BlockSpec((1, C1p), lambda i: (0, 0)),
            pl.BlockSpec((K * K * C1p, C2p), lambda i: (0, 0)),
            pl.BlockSpec((1, C2p), lambda i: (0, 0)),
            pl.BlockSpec((Hs * Ws * C2p, HIDp), lambda i: (0, 0)),
            pl.BlockSpec((1, HIDp), lambda i: (0, 0)),
            pl.BlockSpec((HIDp, NCp), lambda i: (0, 0)),
            pl.BlockSpec((1, NCp), lambda i: (0, 0)),
        ],
        out_specs=pl.BlockSpec((B_tile, NCp), lambda i: (i, 0)),
        compiler_params=pltpu.CompilerParams(
            dimension_semantics=("parallel",),          # lets v7x shard the batch grid
            vmem_limit_bytes=32 * 1024 * 1024,          # > v5e's 16 MiB default scope
        ),
    )(cols1, w1p, b1p, w2p, b2p, w3p, b3p, w4p, b4p)

    # bayesian_net(input, 1) -> (B, 1, C); NoDropoutModel returns .squeeze(1).
    # Strip the class padding (padded columns hold -inf) here.
    mc_output_B_1_C = out_padded[:, None, :NC]
    return mc_output_B_1_C[:, 0, :]


def init_params(key, cin, c1, c2, k, feat_dim, hidden, num_classes):
    ks = jax.random.split(key, 8)
    def w(kk, shape, fan_in):
        return (jax.random.normal(kk, shape, jnp.float32) / jnp.sqrt(fan_in)).astype(jnp.float32)
    return {
        # conv weights stored HWIO: (K, K, Cin, Cout); fc weights (in, out)
        "conv1_w": w(ks[0], (k, k, cin, c1), k * k * cin),
        "conv1_b": 0.01 * jax.random.normal(ks[1], (1, c1), jnp.float32),
        "conv2_w": w(ks[2], (k, k, c1, c2), k * k * c1),
        "conv2_b": 0.01 * jax.random.normal(ks[3], (1, c2), jnp.float32),
        "fc1_w": w(ks[4], (feat_dim, hidden), feat_dim),
        "fc1_b": 0.01 * jax.random.normal(ks[5], (1, hidden), jnp.float32),
        "fc2_w": w(ks[6], (hidden, num_classes), hidden),
        "fc2_b": 0.01 * jax.random.normal(ks[7], (1, num_classes), jnp.float32),
    }


if __name__ == "__main__":
    key = jax.random.PRNGKey(0)
    k_in, k_par = jax.random.split(key)

    # Small shapes: batch=2, channels=4, spatial=16x16, 10 classes.
    B, Cin, H, W = 2, 4, 16, 16
    C1, C2, K = 16, 32, 5
    HIDDEN, NUM_CLASSES = 64, 10
    # spatial trace: 16 -(conv5)-> 12 -(pool)-> 6 -(conv5)-> 2 -(pool)-> 1  => feat = C2*1*1
    FEAT = C2 * 1 * 1

    x = jax.random.normal(k_in, (B, Cin, H, W), jnp.float32)
    params = init_params(k_par, Cin, C1, C2, K, FEAT, HIDDEN, NUM_CLASSES)

    out = no_dropout_model_forward(x, params)
    out = jax.block_until_ready(out)

    assert out.shape == (B, NUM_CLASSES), out.shape
    # log_softmax sanity: probabilities sum to ~1 per row
    prob_sums = jnp.exp(out).sum(axis=-1)
    assert bool(jnp.all(jnp.abs(prob_sums - 1.0) < 1e-3)), prob_sums

    print("KERNEL_OK")
</pallas_src>

<mosaic_0001>
module attributes {stable_mosaic.version = 11 : i64} {
  func.func @kernel(%arg0: i32, %arg1: memref<288x128xbf16, #tpu.memory_space<vmem>>, %arg2: memref<128x128xbf16, #tpu.memory_space<vmem>>, %arg3: memref<1x128xf32, #tpu.memory_space<vmem>>, %arg4: memref<3200x128xbf16, #tpu.memory_space<vmem>>, %arg5: memref<1x128xf32, #tpu.memory_space<vmem>>, %arg6: memref<128x128xbf16, #tpu.memory_space<vmem>>, %arg7: memref<1x128xf32, #tpu.memory_space<vmem>>, %arg8: memref<128x128xbf16, #tpu.memory_space<vmem>>, %arg9: memref<1x128xf32, #tpu.memory_space<vmem>>, %arg10: memref<2x128xf32, #tpu.memory_space<vmem>>) attributes {dimension_semantics = [#tpu.dimension_semantics<parallel>], iteration_bounds = array<i64: 1>, scalar_prefetch = 0 : i64, scratch_operands = 0 : i64, tpu.core_type = #tpu.core_type<tc>, window_params = [{transform_indices = @transform_0, window_bounds = array<i64: 288, 128>}, {pipeline_mode = #tpu.pipeline_mode<synchronous>, transform_indices = @transform_1, window_bounds = array<i64: 128, 128>}, {pipeline_mode = #tpu.pipeline_mode<synchronous>, transform_indices = @transform_2, window_bounds = array<i64: 1, 128>}, {pipeline_mode = #tpu.pipeline_mode<synchronous>, transform_indices = @transform_3, window_bounds = array<i64: 3200, 128>}, {pipeline_mode = #tpu.pipeline_mode<synchronous>, transform_indices = @transform_4, window_bounds = array<i64: 1, 128>}, {pipeline_mode = #tpu.pipeline_mode<synchronous>, transform_indices = @transform_5, window_bounds = array<i64: 128, 128>}, {pipeline_mode = #tpu.pipeline_mode<synchronous>, transform_indices = @transform_6, window_bounds = array<i64: 1, 128>}, {pipeline_mode = #tpu.pipeline_mode<synchronous>, transform_indices = @transform_7, window_bounds = array<i64: 128, 128>}, {pipeline_mode = #tpu.pipeline_mode<synchronous>, transform_indices = @transform_8, window_bounds = array<i64: 1, 128>}, {transform_indices = @transform_9, window_bounds = array<i64: 2, 128>}]} {
    %c0 = arith.constant 0 : index
    %c0_0 = arith.constant 0 : index
    %0 = vector.load %arg1[%c0, %c0_0] : memref<288x128xbf16, #tpu.memory_space<vmem>>, vector<288x128xbf16>
    %c0_1 = arith.constant 0 : index
    %c0_2 = arith.constant 0 : index
    %1 = vector.load %arg2[%c0_1, %c0_2] : memref<128x128xbf16, #tpu.memory_space<vmem>>, vector<128x128xbf16>
    %cst = arith.constant dense<0.000000e+00> : vector<288x128xf32>
    %2 = tpu.matmul %0, %1, %cst {dimension_numbers = #tpu.dot_dimension_numbers<[1], [0], [0], [1], [0, 0, 1, 1], [], []>} : vector<288x128xbf16>, vector<128x128xbf16>, vector<288x128xf32> -> vector<288x128xf32>
    %c0_3 = arith.constant 0 : index
    %c0_4 = arith.constant 0 : index
    %3 = vector.load %arg3[%c0_3, %c0_4] : memref<1x128xf32, #tpu.memory_space<vmem>>, vector<1x128xf32>
    %4 = vector.broadcast %3 : vector<1x128xf32> to vector<288x128xf32>
    %5 = arith.addf %2, %4 : vector<288x128xf32>
    %6 = vector.shape_cast %5 : vector<288x128xf32> to vector<2x12x12x128xf32>
    %7 = vector.shape_cast %6 : vector<2x12x12x128xf32> to vector<2x6x2x12x128xf32>
    %8 = vector.extract_strided_slice %7 {offsets = [0, 0, 0, 0, 0], sizes = [2, 6, 1, 12, 128], strides = [1, 1, 1, 1, 1]} : vector<2x6x2x12x128xf32> to vector<2x6x1x12x128xf32>
    %9 = vector.shape_cast %8 : vector<2x6x1x12x128xf32> to vector<2x6x12x128xf32>
    %10 = vector.extract_strided_slice %7 {offsets = [0, 0, 1, 0, 0], sizes = [2, 6, 1, 12, 128], strides = [1, 1, 1, 1, 1]} : vector<2x6x2x12x128xf32> to vector<2x6x1x12x128xf32>
    %11 = vector.shape_cast %10 : vector<2x6x1x12x128xf32> to vector<2x6x12x128xf32>
    %12 = arith.maximumf %9, %11 : vector<2x6x12x128xf32>
    %13 = vector.shape_cast %12 : vector<2x6x12x128xf32> to vector<2x6x6x2x128xf32>
    %14 = vector.extract_strided_slice %13 {offsets = [0, 0, 0, 0, 0], sizes = [2, 6, 6, 1, 128], strides = [1, 1, 1, 1, 1]} : vector<2x6x6x2x128xf32> to vector<2x6x6x1x128xf32>
    %15 = vector.shape_cast %14 : vector<2x6x6x1x128xf32> to vector<2x6x6x128xf32>
    %16 = vector.extract_strided_slice %13 {offsets = [0, 0, 0, 1, 0], sizes = [2, 6, 6, 1, 128], strides = [1, 1, 1, 1, 1]} : vector<2x6x6x2x128xf32> to vector<2x6x6x1x128xf32>
    %17 = vector.shape_cast %16 : vector<2x6x6x1x128xf32> to vector<2x6x6x128xf32>
    %18 = arith.maximumf %15, %17 : vector<2x6x6x128xf32>
    %cst_5 = arith.constant 0.000000e+00 : f32
    %19 = vector.broadcast %cst_5 : f32 to vector<2x6x6x128xf32>
    %20 = arith.maximumf %18, %19 : vector<2x6x6x128xf32>
    %21 = arith.truncf %20 : vector<2x6x6x128xf32> to vector<2x6x6x128xbf16>
    %22 = vector.extract_strided_slice %21 {offsets = [0, 0, 0, 0], sizes = [2, 6, 2, 128], strides = [1, 1, 1, 1]} : vector<2x6x6x128xbf16> to vector<2x6x2x128xbf16>
    %23 = vector.extract_strided_slice %21 {offsets = [0, 0, 1, 0], sizes = [2, 6, 2, 128], strides = [1, 1, 1, 1]} : vector<2x6x6x128xbf16> to vector<2x6x2x128xbf16>
    %24 = vector.extract_strided_slice %21 {offsets = [0, 0, 2, 0], sizes = [2, 6, 2, 128], strides = [1, 1, 1, 1]} : vector<2x6x6x128xbf16> to vector<2x6x2x128xbf16>
    %25 = vector.extract_strided_slice %21 {offsets = [0, 0, 3, 0], sizes = [2, 6, 2, 128], strides = [1, 1, 1, 1]} : vector<2x6x6x128xbf16> to vector<2x6x2x128xbf16>
    %26 = vector.extract_strided_slice %21 {offsets = [0, 0, 4, 0], sizes = [2, 6, 2, 128], strides = [1, 1, 1, 1]} : vector<2x6x6x128xbf16> to vector<2x6x2x128xbf16>
    %27 = tpu.concatenate %22, %23, %24, %25, %26 in 3 : vector<2x6x2x128xbf16>, vector<2x6x2x128xbf16>, vector<2x6x2x128xbf16>, vector<2x6x2x128xbf16>, vector<2x6x2x128xbf16> -> vector<2x6x2x640xbf16>
    %28 = vector.extract_strided_slice %27 {offsets = [0, 0, 0, 0], sizes = [2, 2, 2, 640], strides = [1, 1, 1, 1]} : vector<2x6x2x640xbf16> to vector<2x2x2x640xbf16>
    %29 = vector.extract_strided_slice %27 {offsets = [0, 1, 0, 0], sizes = [2, 2, 2, 640], strides = [1, 1, 1, 1]} : vector<2x6x2x640xbf16> to vector<2x2x2x640xbf16>
    %30 = vector.extract_strided_slice %27 {offsets = [0, 2, 0, 0], sizes = [2, 2, 2, 640], strides = [1, 1, 1, 1]} : vector<2x6x2x640xbf16> to vector<2x2x2x640xbf16>
    %31 = vector.extract_strided_slice %27 {offsets = [0, 3, 0, 0], sizes = [2, 2, 2, 640], strides = [1, 1, 1, 1]} : vector<2x6x2x640xbf16> to vector<2x2x2x640xbf16>
    %32 = vector.extract_strided_slice %27 {offsets = [0, 4, 0, 0], sizes = [2, 2, 2, 640], strides = [1, 1, 1, 1]} : vector<2x6x2x640xbf16> to vector<2x2x2x640xbf16>
    %33 = tpu.concatenate %28, %29, %30, %31, %32 in 3 : vector<2x2x2x640xbf16>, vector<2x2x2x640xbf16>, vector<2x2x2x640xbf16>, vector<2x2x2x640xbf16>, vector<2x2x2x640xbf16> -> vector<2x2x2x3200xbf16>
    %34 = vector.shape_cast %33 : vector<2x2x2x3200xbf16> to vector<8x3200xbf16>
    %c0_6 = arith.constant 0 : index
    %c0_7 = arith.constant 0 : index
    %35 = vector.load %arg4[%c0_6, %c0_7] : memref<3200x128xbf16, #tpu.memory_space<vmem>>, vector<3200x128xbf16>
    %cst_8 = arith.constant dense<0.000000e+00> : vector<8x128xf32>
    %36 = tpu.matmul %34, %35, %cst_8 {dimension_numbers = #tpu.dot_dimension_numbers<[1], [0], [0], [1], [0, 0, 1, 1], [], []>} : vector<8x3200xbf16>, vector<3200x128xbf16>, vector<8x128xf32> -> vector<8x128xf32>
    %c0_9 = arith.constant 0 : index
    %c0_10 = arith.constant 0 : index
    %37 = vector.load %arg5[%c0_9, %c0_10] : memref<1x128xf32, #tpu.memory_space<vmem>>, vector<1x128xf32>
    %38 = vector.broadcast %37 : vector<1x128xf32> to vector<8x128xf32>
    %39 = arith.addf %36, %38 : vector<8x128xf32>
    %40 = vector.shape_cast %39 : vector<8x128xf32> to vector<2x2x2x128xf32>
    %41 = vector.shape_cast %40 : vector<2x2x2x128xf32> to vector<2x1x2x2x128xf32>
    %42 = vector.extract_strided_slice %41 {offsets = [0, 0, 0, 0, 0], sizes = [2, 1, 1, 2, 128], strides = [1, 1, 1, 1, 1]} : vector<2x1x2x2x128xf32> to vector<2x1x1x2x128xf32>
    %43 = vector.shape_cast %42 : vector<2x1x1x2x128xf32> to vector<2x1x2x128xf32>
    %44 = vector.extract_strided_slice %41 {offsets = [0, 0, 1, 0, 0], sizes = [2, 1, 1, 2, 128], strides = [1, 1, 1, 1, 1]} : vector<2x1x2x2x128xf32> to vector<2x1x1x2x128xf32>
    %45 = vector.shape_cast %44 : vector<2x1x1x2x128xf32> to vector<2x1x2x128xf32>
    %46 = arith.maximumf %43, %45 : vector<2x1x2x128xf32>
    %47 = vector.shape_cast %46 : vector<2x1x2x128xf32> to vector<2x1x1x2x128xf32>
    %48 = vector.extract_strided_slice %47 {offsets = [0, 0, 0, 0, 0], sizes = [2, 1, 1, 1, 128], strides = [1, 1, 1, 1, 1]} : vector<2x1x1x2x128xf32> to vector<2x1x1x1x128xf32>
    %49 = vector.shape_cast %48 : vector<2x1x1x1x128xf32> to vector<2x1x1x128xf32>
    %50 = vector.extract_strided_slice %47 {offsets = [0, 0, 0, 1, 0], sizes = [2, 1, 1, 1, 128], strides = [1, 1, 1, 1, 1]} : vector<2x1x1x2x128xf32> to vector<2x1x1x1x128xf32>
    %51 = vector.shape_cast %50 : vector<2x1x1x1x128xf32> to vector<2x1x1x128xf32>
    %52 = arith.maximumf %49, %51 : vector<2x1x1x128xf32>
    %cst_11 = arith.constant 0.000000e+00 : f32
    %53 = vector.broadcast %cst_11 : f32 to vector<2x1x1x128xf32>
    %54 = arith.maximumf %52, %53 : vector<2x1x1x128xf32>
    %55 = vector.shape_cast %54 : vector<2x1x1x128xf32> to vector<2x128xf32>
    %56 = arith.truncf %55 : vector<2x128xf32> to vector<2x128xbf16>
    %c0_12 = arith.constant 0 : index
    %c0_13 = arith.constant 0 : index
    %57 = vector.load %arg6[%c0_12, %c0_13] : memref<128x128xbf16, #tpu.memory_space<vmem>>, vector<128x128xbf16>
    %cst_14 = arith.constant dense<0.000000e+00> : vector<2x128xf32>
    %58 = tpu.matmul %56, %57, %cst_14 {dimension_numbers = #tpu.dot_dimension_numbers<[1], [0], [0], [1], [0, 0, 1, 1], [], []>} : vector<2x128xbf16>, vector<128x128xbf16>, vector<2x128xf32> -> vector<2x128xf32>
    %c0_15 = arith.constant 0 : index
    %c0_16 = arith.constant 0 : index
    %59 = vector.load %arg7[%c0_15, %c0_16] : memref<1x128xf32, #tpu.memory_space<vmem>>, vector<1x128xf32>
    %60 = vector.broadcast %59 : vector<1x128xf32> to vector<2x128xf32>
    %61 = arith.addf %58, %60 : vector<2x128xf32>
    %cst_17 = arith.constant 0.000000e+00 : f32
    %62 = vector.broadcast %cst_17 : f32 to vector<2x128xf32>
    %63 = arith.maximumf %61, %62 : vector<2x128xf32>
    %64 = arith.truncf %63 : vector<2x128xf32> to vector<2x128xbf16>
    %c0_18 = arith.constant 0 : index
    %c0_19 = arith.constant 0 : index
    %65 = vector.load %arg8[%c0_18, %c0_19] : memref<128x128xbf16, #tpu.memory_space<vmem>>, vector<128x128xbf16>
    %cst_20 = arith.constant dense<0.000000e+00> : vector<2x128xf32>
    %66 = tpu.matmul %64, %65, %cst_20 {dimension_numbers = #tpu.dot_dimension_numbers<[1], [0], [0], [1], [0, 0, 1, 1], [], []>} : vector<2x128xbf16>, vector<128x128xbf16>, vector<2x128xf32> -> vector<2x128xf32>
    %c0_21 = arith.constant 0 : index
    %c0_22 = arith.constant 0 : index
    %67 = vector.load %arg9[%c0_21, %c0_22] : memref<1x128xf32, #tpu.memory_space<vmem>>, vector<1x128xf32>
    %68 = vector.broadcast %67 : vector<1x128xf32> to vector<2x128xf32>
    %69 = arith.addf %66, %68 : vector<2x128xf32>
    %70 = tpu.iota {dimensions = array<i32: 1>} : vector<2x128xi32>
    %c10_i32 = arith.constant 10 : i32
    %71 = vector.broadcast %c10_i32 : i32 to vector<2x128xi32>
    %72 = arith.cmpi slt, %70, %71 : vector<2x128xi32>
    %cst_23 = arith.constant 0xFF800000 : f32
    %73 = vector.broadcast %cst_23 : f32 to vector<2x128xf32>
    %74 = arith.select %72, %69, %73 : vector<2x128xi1>, vector<2x128xf32>
    %cst_24 = arith.constant dense<0xFF800000> : vector<2xf32>
    %75 = vector.multi_reduction <maximumf>, %74, %cst_24 [1] : vector<2x128xf32> to vector<2xf32>
    %76 = vector.shape_cast %75 : vector<2xf32> to vector<2x1xf32>
    %77 = vector.broadcast %76 : vector<2x1xf32> to vector<2x128xf32>
    %78 = arith.subf %74, %77 : vector<2x128xf32>
    %79 = math.exp %78 : vector<2x128xf32>
    %cst_25 = arith.constant dense<0.000000e+00> : vector<2xf32>
    %80 = vector.multi_reduction <add>, %79, %cst_25 [1] : vector<2x128xf32> to vector<2xf32>
    %81 = vector.shape_cast %80 : vector<2xf32> to vector<2x1xf32>
    %82 = math.log %81 : vector<2x1xf32>
    %83 = vector.broadcast %82 : vector<2x1xf32> to vector<2x128xf32>
    %84 = arith.subf %78, %83 : vector<2x128xf32>
    %c0_26 = arith.constant 0 : index
    %c0_27 = arith.constant 0 : index
    %85 = vector.load %arg10[%c0_26, %c0_27] : memref<2x128xf32, #tpu.memory_space<vmem>>, vector<2x128xf32>
    tpu.vector_store %arg10[%c0_26, %c0_27], %84 {strides = array<i32>} : memref<2x128xf32, #tpu.memory_space<vmem>>, vector<2x128xf32>,
    return
  }
  func.func @transform_0(%arg0: i32) -> (i32, i32) {
    %c0_i32 = arith.constant 0 : i32
    %c0_i32_0 = arith.constant 0 : i32
    return %arg0, %c0_i32 : i32, i32
  }
  func.func @transform_1(%arg0: i32) -> (i32, i32) {
    %c0_i32 = arith.constant 0 : i32
    %c0_i32_0 = arith.constant 0 : i32
    %c0_i32_1 = arith.constant 0 : i32
    return %c0_i32, %c0_i32_0 : i32, i32
  }
  func.func @transform_2(%arg0: i32) -> (i32, i32) {
    %c0_i32 = arith.constant 0 : i32
    %c0_i32_0 = arith.constant 0 : i32
    %c0_i32_1 = arith.constant 0 : i32
    return %c0_i32, %c0_i32_0 : i32, i32
  }
  func.func @transform_3(%arg0: i32) -> (i32, i32) {
    %c0_i32 = arith.constant 0 : i32
    %c0_i32_0 = arith.constant 0 : i32
    %c0_i32_1 = arith.constant 0 : i32
    return %c0_i32, %c0_i32_0 : i32, i32
  }
  func.func @transform_4(%arg0: i32) -> (i32, i32) {
    %c0_i32 = arith.constant 0 : i32
    %c0_i32_0 = arith.constant 0 : i32
    %c0_i32_1 = arith.constant 0 : i32
    return %c0_i32, %c0_i32_0 : i32, i32
  }
  func.func @transform_5(%arg0: i32) -> (i32, i32) {
    %c0_i32 = arith.constant 0 : i32
    %c0_i32_0 = arith.constant 0 : i32
    %c0_i32_1 = arith.constant 0 : i32
    return %c0_i32, %c0_i32_0 : i32, i32
  }
  func.func @transform_6(%arg0: i32) -> (i32, i32) {
    %c0_i32 = arith.constant 0 : i32
    %c0_i32_0 = arith.constant 0 : i32
    %c0_i32_1 = arith.constant 0 : i32
    return %c0_i32, %c0_i32_0 : i32, i32
  }
  func.func @transform_7(%arg0: i32) -> (i32, i32) {
    %c0_i32 = arith.constant 0 : i32
    %c0_i32_0 = arith.constant 0 : i32
    %c0_i32_1 = arith.constant 0 : i32
    return %c0_i32, %c0_i32_0 : i32, i32
  }
  func.func @transform_8(%arg0: i32) -> (i32, i32) {
    %c0_i32 = arith.constant 0 : i32
    %c0_i32_0 = arith.constant 0 : i32
    %c0_i32_1 = arith.constant 0 : i32
    return %c0_i32, %c0_i32_0 : i32, i32
  }
  func.func @transform_9(%arg0: i32) -> (i32, i32) {
    %c0_i32 = arith.constant 0 : i32
    %c0_i32_0 = arith.constant 0 : i32
    return %arg0, %c0_i32 : i32, i32
  }
}

</mosaic_0001>

<bundles_post_ra>
// kernel: no_dropout_model_forward.1
= control target key start
LH: loop header
LB: loop body
LE: loop exit
PB: predicated region body
PF: predicated region fallthrough
CT: control target
= control target key end

     0   :  { %s7951_s0 = inlined_call_operand.vmem [shape: bf16[288,128], index: 0, kind: input, shape index: {}]   ;;  %s7952_s1 = inlined_call_operand.vmem [shape: bf16[128,128], index: 1, kind: input, shape index: {}]   ;;  %s7953_s2 = inlined_call_operand.vmem [shape: f32[1,128], index: 2, kind: input, shape index: {}]   ;;  %s7954_s3 = inlined_call_operand.vmem [shape: bf16[3200,128], index: 3, kind: input, shape index: {}]   ;;  %s7955_s4 = inlined_call_operand.vmem [shape: f32[1,128], index: 4, kind: input, shape index: {}]   ;;  %s7956_s5 = inlined_call_operand.vmem [shape: bf16[128,128], index: 5, kind: input, shape index: {}]   ;;  %s7957_s6 = inlined_call_operand.vmem [shape: f32[1,128], index: 6, kind: input, shape index: {}]   ;;  %s7958_s7 = inlined_call_operand.vmem [shape: bf16[128,128], index: 7, kind: input, shape index: {}]   ;;  %s7959_s8 = inlined_call_operand.vmem [shape: f32[1,128], index: 8, kind: input, shape index: {}]   ;;  %s7960_s9 = inlined_call_operand.hbm [shape: f32[2,128], index: 9, kind: output, shape index: {}]  }
   0x1   :  { %v5863_v0 = vld [vmem:[%s7952_s1] sm:$0xff]   ;;  %v5864_v1 = vld [vmem:[%s7952_s1 + $0x8] sm:$0xff]   ;;  %v5865_v2 = vld [vmem:[%s7952_s1 + $0x10] sm:$0xff]  }
   0x2   :  { %5746 = vmatprep.subr.bf16.mxu0 %v5863_v0  ;;  %v5866_v3 = vld [vmem:[%s7952_s1 + $0x18] sm:$0xff]   ;;  %v5871_v4 = vld [vmem:[%s7951_s0] sm:$0xff]   ;;  %v5868_v6 = vld [vmem:[%s7952_s1 + $0x28] sm:$0xff]  }
   0x3   :  { %5747 = vmatpush3.bf16.msra.mxu0 %v5863_v0  ;;  %5762 = vmatprep.mubr.bf16.mxu0 %v5871_v4  ;;  %v5867_v5 = vld [vmem:[%s7952_s1 + $0x20] sm:$0xff]   ;;  %v5869_v7 = vld [vmem:[%s7952_s1 + $0x30] sm:$0xff]   ;;  %v5870_v8 = vld [vmem:[%s7952_s1 + $0x38] sm:$0xff]  }
   0x4   :  { %5748 = vmatprep.subr.bf16.mxu0 %v5864_v1  ;;  %v5872_v9 = vld [vmem:[%s7951_s0 + $0x8] sm:$0xff]   ;;  %v5873_v10 = vld [vmem:[%s7951_s0 + $0x10] sm:$0xff]   ;;  %v5874_v11 = vld [vmem:[%s7951_s0 + $0x18] sm:$0xff]  }
   0x5   :  { %v5875_v12 = vld [vmem:[%s7951_s0 + $0x20] sm:$0xff]   ;;  %v5876_v13 = vld [vmem:[%s7951_s0 + $0x28] sm:$0xff]   ;;  %v5877_v14 = vld [vmem:[%s7951_s0 + $0x30] sm:$0xff]  }
   0x6   :  { %v5878_v15 = vld [vmem:[%s7951_s0 + $0x38] sm:$0xff]   ;;  %v5879_v16 = vld [vmem:[%s7951_s0 + $0x40] sm:$0xff]   ;;  %v5880_v17 = vld [vmem:[%s7951_s0 + $0x48] sm:$0xff]  }
   0x7   :  { %5749 = vmatpush3.bf16.msra.mxu0 %v5864_v1  ;;  %v5881_v18 = vld [vmem:[%s7951_s0 + $0x50] sm:$0xff]   ;;  %v5882_v19 = vld [vmem:[%s7951_s0 + $0x58] sm:$0xff]   ;;  %v5883_v20 = vld [vmem:[%s7951_s0 + $0x60] sm:$0xff]  }
   0x8   :  { %5750 = vmatprep.subr.bf16.mxu0 %v5865_v2  ;;  %v5884_v21 = vld [vmem:[%s7951_s0 + $0x68] sm:$0xff]   ;;  %v5885_v22 = vld [vmem:[%s7951_s0 + $0x70] sm:$0xff]   ;;  %v5886_v23 = vld [vmem:[%s7951_s0 + $0x78] sm:$0xff]  }
   0x9   :  { %v5887_v24 = vld [vmem:[%s7951_s0 + $0x80] sm:$0xff]   ;;  %v5888_v25 = vld [vmem:[%s7951_s0 + $0x88] sm:$0xff]  }
   0xb   :  { %5751 = vmatpush3.bf16.msra.mxu0 %v5865_v2 }
   0xc   :  { %5752 = vmatprep.subr.bf16.mxu0 %v5866_v3 }
   0xf   :  { %5753 = vmatpush3.bf16.msra.mxu0 %v5866_v3 }
  0x10   :  { %5754 = vmatprep.subr.bf16.mxu0 %v5867_v5 }
  0x13   :  { %5755 = vmatpush3.bf16.msra.mxu0 %v5867_v5 }
  0x14   :  { %5756 = vmatprep.subr.bf16.mxu0 %v5868_v6 }
  0x17   :  { %5757 = vmatpush3.bf16.msra.mxu0 %v5868_v6 }
  0x18   :  { %5758 = vmatprep.subr.bf16.mxu0 %v5869_v7 }
  0x1b   :  { %5759 = vmatpush3.bf16.msra.mxu0 %v5869_v7 }
  0x1c   :  { %5760 = vmatprep.subr.bf16.mxu0 %v5870_v8 }
  0x1f   :  { %5761 = vmatpush3.bf16.msra.mxu0 %v5870_v8 }
  0x22   :  { %5763 = vmatmul.mubr.bf16.vlgmr.msra.gmra.mrb[0].mxu0 %v5872_v9 }
  0x23   :  { %5766 = vmatprep.mubr.bf16.mxu0 %v5873_v10 }
  0x2a   :  { %5767 = vmatmul.mubr.bf16.gmra.mrb[4].mxu0 %v5874_v11 }
  0x2b   :  { %5770 = vmatprep.mubr.bf16.mxu0 %v5875_v12 }
  0x32   :  { %5771 = vmatmul.mubr.bf16.gmra.mrb[8].mxu0 %v5876_v13 }
  0x33   :  { %5774 = vmatprep.mubr.bf16.mxu0 %v5877_v14 }
  0x3a   :  { %5775 = vmatmul.mubr.bf16.gmra.mrb[12].mxu0 %v5878_v15 }
  0x3b   :  { %5778 = vmatprep.mubr.bf16.mxu0 %v5879_v16 }
  0x42   :  { %5779 = vmatmul.mubr.bf16.gmra.mrb[16].mxu0 %v5880_v17 }
  0x43   :  { %5782 = vmatprep.mubr.bf16.mxu0 %v5881_v18 }
  0x4a   :  { %5783 = vmatmul.mubr.bf16.gmra.mrb[20].mxu0 %v5882_v19 }
  0x4b   :  { %5786 = vmatprep.mubr.bf16.mxu0 %v5883_v20 }
  0x52   :  { %5787 = vmatmul.mubr.bf16.gmra.mrb[24].mxu0 %v5884_v21 }
  0x53   :  { %5790 = vmatprep.mubr.bf16.mxu0 %v5885_v22 }
  0x5a   :  { %5791 = vmatmul.mubr.bf16.gmra.mrb[28].mxu0 %v5886_v23 }
  0x5b   :  { %5794 = vmatprep.mubr.bf16.mxu0 %v5887_v24 }
  0x62   :  { %5795 = vmatmul.mubr.bf16.gmra.mrb[32].mxu0 %v5888_v25 }
  0x63   :  { %14 = vsyncpa [#allocation3], 0  ;;  %v5889_v26 = vld [vmem:[%s7954_s3 + $0x40] sm:$0xff]   ;;  %v5891_v28 = vld [vmem:[%s7954_s3 + $0x48] sm:$0xff]   ;;  %v6134_v30 = vmov 1983009808   ;;  %v7961_v32 = vlaneseq }
  0x64   :  { %v5890_v27 = vld [vmem:[%s7954_s3] sm:$0xff]   ;;  %5455 = vmatprep.subr.bf16.mxu1 %v5889_v26  ;;  %v5892_v29 = vld [vmem:[%s7954_s3 + $0x8] sm:$0xff]   ;;  %v607_v31 = vunpack.c.l.s4 %v6134_v30  ;;  %v5893_v43 = vld [vmem:[%s7954_s3 + $0x50] sm:$0xff]   ;;  %vm1447_vm0 = vcmask 1041409   ;;  %vm6137_vm1 = vmmov 0   ;;  %vm5021_vm3 = vcmask 1041408  }
  0x65   :  { %5456 = vmatpush3.bf16.msra.mxu1 %v5890_v27  ;;  %v6282_v33 = vld [vmem:[%s7953_s2] ss:$0 sm:$0xff]  ;;  %v6285_v36 = vshrl.u32 %v7961_v32, 7  ;;  %v5894_v47 = vld [vmem:[%s7954_s3 + $0x10] sm:$0xff]   ;;  %v5897_v53 = vld [vmem:[%s7954_s3 + $0x58] sm:$0xff]  }
  0x66   :  { %5457 = vmatprep.subr.bf16.mxu1 %v5891_v28  ;;  %v608_v35 = vunpack.c.0.s8 %v607_v31  ;;  %v5895_v48 = vld [vmem:[%s7954_s3 + $0x1c0] sm:$0xff]   ;;  %v5898_v6 = vld [vmem:[%s7954_s3 + $0x18] sm:$0xff]   ;;  %v5899_v23 = vld [vmem:[%s7954_s3 + $0x1c8] sm:$0xff]  }
  0x67   :  { %8020 = vst [vmem:[#allocation5_spill] sm:$0xff] %v6285_v36  ;;  %v5896_v52 = vld [vmem:[%s7954_s3 + $0x180] sm:$0xff]   ;;  %5521 = vmatprep.subr.bf16.mxu0 %v5895_v48 }
  0x68   :  { %v6293_v45 = vsub.s32 %v608_v35, %v6285_v36  ;;  %5522 = vmatpush3.bf16.msra.mxu0 %v5896_v52 }
  0x69   :  { %5458 = vmatpush3.bf16.msra.mxu1 %v5892_v29  ;;  %5523 = vmatprep.subr.bf16.mxu0 %v5899_v23 }
  0x6a   :  { %5459 = vmatprep.subr.bf16.mxu1 %v5893_v43 }
  0x6d   :  { %5460 = vmatpush3.bf16.msra.mxu1 %v5894_v47 }
  0x6e   :  { %5461 = vmatprep.subr.bf16.mxu1 %v5897_v53 }
  0x71   :  { %5462 = vmatpush3.bf16.msra.mxu1 %v5898_v6 }
  0xf5   :  { %v5764_v34 = vpop.f32.mrb[0].mxu0 }
  0xf6   :  { %v292_v37 = vadd.f32 %v5764_v34, %v6282_v33  ;;  %v283_v38 = vpop.f32.mrb[1].mxu0 }
  0xf7   :  { %v284_v39 = vadd.f32 %v6282_v33, %v283_v38  ;;  %v5765_v40 = vpop.f32.mrb[2].mxu0 }
  0xf8   :  { %v464_v41 = vcombine.high %v292_v37, %v292_v37  ;;  %v286_v42 = vpop.f32.mrb[3].mxu0  ;;  %v6311_v58 = vadd.f32 %v5765_v40, %v6282_v33 }
  0xf9   :  { %v462_v44 = vcombine.high %v284_v39, %v284_v39  ;;  %v287_v46 = vadd.f32 %v6282_v33, %v286_v42 }
  0xfa   :  { %v465_v47 = vcombine.high %v6311_v58, %v6311_v58 }
  0xfb   :  { %v535_v49 = vmax.f32 %v462_v44, %v292_v37  ;;  %v463_v50 = vcombine.high %v287_v46, %v287_v46  ;;  %v536_v51 = vmax.f32 %v287_v46, %v464_v41 }
  0xfd   :  { %v620_v54 = vrot.slane %v535_v49, %v6293_v45  ;;  %v534_v55 = vmax.f32 %v284_v39, %v463_v50  ;;  %v628_v56 = vrot.slane %v536_v51, %v6293_v45  ;;  %v5768_v57 = vpop.f32.mrb[4].mxu0 }
  0xfe   :  { %v299_v59 = vpop.f32.mrb[5].mxu0  ;;  %v6315_v2 = vadd.f32 %v5768_v57, %v6282_v33 }
  0xff   :  { %v621_v60 = vcombine.high %v620_v54, %v620_v54  ;;  %v5078_v61 = vrot.slane %v620_v54, 9  ;;  %v612_v62 = vrot.slane %v534_v55, %v6293_v45  ;;  %v629_v63 = vcombine.high %v628_v56, %v628_v56  ;;  %v5769_v0 = vpop.f32.mrb[6].mxu0 }
 0x100   :  { %v5080_v1 = vrot.slane %v628_v56, 9  ;;  %v6318_v3 = vadd.f32 %v6282_v33, %v299_v59  ;;  %v6321_v4 = vadd.f32 %v5769_v0, %v6282_v33  ;;  %v302_v5 = vpop.f32.mrb[7].mxu0  ;;  %v468_v49 = vcombine.high %v6315_v2, %v6315_v2 }
 0x101   :  { %v5079_v7 = vrot.slane %v621_v60, 9  ;;  %v1184_v8 = vmax.f32 %v620_v54, %v5078_v61  ;;  %v613_v9 = vcombine.high %v612_v62, %v612_v62  ;;  %v5076_v10 = vrot.slane %v612_v62, 9 }
 0x102   :  { %v5081_v11 = vrot.slane %v629_v63, 9  ;;  %v1186_v12 = vmax.f32 %v628_v56, %v5080_v1  ;;  %v466_v13 = vcombine.high %v6318_v3, %v6318_v3  ;;  %v469_v14 = vcombine.high %v6321_v4, %v6321_v4 }
 0x103   :  { %v1185_v15 = vmax.f32 %v621_v60, %v5079_v7  ;;  %v1256_v16 = vmax.f32 %v1184_v8, 0.0  ;;  %v5077_v17 = vrot.slane %v613_v9, 9  ;;  %v1182_v18 = vmax.f32 %v612_v62, %v5076_v10  ;;  %v5900_v62 = vld [vmem:[%s7954_s3 + $0x188] sm:$0xff]  }
 0x104   :  { %v1187_v19 = vmax.f32 %v629_v63, %v5081_v11  ;;  %v1258_v20 = vmax.f32 %v1186_v12, 0.0  ;;  %v537_v21 = vmax.f32 %v6311_v58, %v466_v13  ;;  %v540_v22 = vmax.f32 %v6315_v2, %v469_v14  ;;  %5524 = vmatpush3.bf16.msra.mxu0 %v5900_v62 }
 0x105   :  { %v1257_v24 = vmax.f32 %v1185_v15, 0.0  ;;  %v6335_v25 = vpack.c.bf16 %v1256_v16, %v1256_v16  ;;  %v1183_v26 = vmax.f32 %v613_v9, %v5077_v17  ;;  %v1254_v27 = vmax.f32 %v1182_v18, 0.0  ;;  %v5772_v28 = vpop.f32.mrb[8].mxu0 }
 0x106   :  { %v1259_v29 = vmax.f32 %v1187_v19, 0.0  ;;  %v1330_v30 = vpack.c.bf16 %v1258_v20, %v1258_v20  ;;  %v636_v31 = vrot.slane %v537_v21, %v6293_v45  ;;  %v315_v34 = vpop.f32.mrb[9].mxu0  ;;  %v660_v39 = vrot.slane %v540_v22, %v6293_v45 }
 0x107   :  { %v6338_v35 = vpack.c.bf16 %v1257_v24, %v1257_v24  ;;  %v7964_v37 = vunpack.c.l.b16 %v6335_v25  ;;  %v1255_v38 = vmax.f32 %v1183_v26, 0.0  ;;  %v5773_v40 = vpop.f32.mrb[10].mxu0  ;;  %v6342_v41 = vpack.c.bf16 %v1254_v27, %v1254_v27 }
 0x108   :  { %v1331_v42 = vpack.c.bf16 %v1259_v29, %v1259_v29  ;;  %v637_v43 = vcombine.high %v636_v31, %v636_v31  ;;  %v5082_v44 = vrot.slane %v636_v31, 9  ;;  %v6344_v46 = vpop.f32.mrb[11].mxu0  ;;  %v1615_v51 = vunpack.c.l.b16 %v1330_v30 }
 0x109   :  { %v6348_v48 = vpack.c.bf16 %v1255_v38, %v1255_v38  ;;  %v7963_v50 = vunpack.c.l.b16 %v6338_v35  ;;  %v6355_v54 = vrot.slane %v7964_v37, 7  ;;  %v661_v56 = vcombine.high %v660_v39, %v660_v39 }
 0x10a   :  { %v1675_v52 = vunpack.c.l.b16 %v1331_v42  ;;  %v5083_v53 = vrot.slane %v637_v43, 9  ;;  %v6357_v55 = vmax.f32 %v636_v31, %v5082_v44  ;;  %v5088_v57 = vrot.slane %v660_v39, 9 }
 0x10b   :  { %v7965_v59 = vunpack.c.l.b16 %v6348_v48  ;;  %v303_v61 = vadd.f32 %v6282_v33, %v302_v5  ;;  %v5089_v0 = vrot.slane %v661_v56, 9  ;;  %v6366_v2 = vadd.f32 %v5772_v28, %v6282_v33 }
 0x10c   :  { %v1189_v60 = vmax.f32 %v637_v43, %v5083_v53  ;;  %v1687_v63 = vrot.slane %v1675_v52, 7  ;;  %v1194_v1 = vmax.f32 %v660_v39, %v5088_v57  ;;  %v6372_v7 = vrot.slane %v7963_v50, 7  ;;  %v5902_v39 = vld [vmem:[%s7954_s3 + $0x20] sm:$0xff]   ;;  %v5904_v57 = vld [vmem:[%s7954_s3 + $0x190] sm:$0xff]  }
 0x10d   :  { %v6368_v6 = vpop.f32.mrb[12].mxu0  ;;  %v6374_v8 = vrot.slane %v1615_v51, 7  ;;  %v467_v5 = vcombine.high %v303_v61, %v303_v61  ;;  %v1260_v11 = vmax.f32 %v6357_v55, 0.0  ;;  %v1195_v12 = vmax.f32 %v661_v56, %v5089_v0  ;;  %v5905_v0 = vld [vmem:[%s7954_s3 + $0x68] sm:$0xff]  }
 0x10e   :  { %v1261_v9 = vmax.f32 %v1189_v60, 0.0  ;;  %v6376_v10 = vpop.f32.mrb[13].mxu0  ;;  %v1266_v13 = vmax.f32 %v1194_v1, 0.0  ;;  %v538_v14 = vmax.f32 %v465_v47, %v303_v61  ;;  %v6383_v16 = vrot.slane %v7965_v59, 7 }
 0x10f   :  { %v6379_v15 = vpop.f32.mrb[14].mxu0  ;;  %v539_v18 = vmax.f32 %v6318_v3, %v467_v5  ;;  %v316_v19 = vadd.f32 %v6282_v33, %v315_v34  ;;  %v6392_v21 = vsel %vm1447_vm0, %v1687_v63, %v1615_v51  ;;  %v1267_v22 = vmax.f32 %v1195_v12, 0.0  ;;  %v5901_v3 = vld [vmem:[%s7954_s3 + $0x60] sm:$0xff]  }
 0x110   :  { %v6385_v17 = vpack.c.bf16 %v1261_v9, %v1261_v9  ;;  %v6389_v20 = vpop.f32.mrb[15].mxu0  ;;  %8021 = vst [vmem:[#allocation6_spill] sm:$0xff] %v6392_v21  ;;  %v644_v23 = vrot.slane %v538_v14, %v6293_v45  ;;  %v472_v24 = vcombine.high %v6366_v2, %v6366_v2  ;;  %v6397_v26 = vpack.c.bf16 %v1266_v13, %v1266_v13  ;;  %v5906_v14 = vld [vmem:[%s7954_s3 + $0x28] sm:$0xff]  }
 0x111   :  { %v652_v27 = vrot.slane %v539_v18, %v6293_v45  ;;  %v470_v28 = vcombine.high %v316_v19, %v316_v19  ;;  %v541_v29 = vmax.f32 %v468_v49, %v316_v19  ;;  %v6403_v30 = vpack.c.bf16 %v1267_v22, %v1267_v22  ;;  %5463 = vmatprep.subr.bf16.mxu1 %v5901_v3  ;;  %v5903_v49 = vld [vmem:[%s7954_s3 + $0x1d0] sm:$0xff]  }
 0x112   :  { %v645_v31 = vcombine.high %v644_v23, %v644_v23  ;;  %v5084_v34 = vrot.slane %v644_v23, 9  ;;  %v6406_v38 = vadd.f32 %v5773_v40, %v6282_v33  ;;  %v7967_v42 = vunpack.c.l.b16 %v6385_v17  ;;  %5464 = vmatpush3.bf16.msra.mxu1 %v5902_v39  ;;  %5525 = vmatprep.subr.bf16.mxu0 %v5903_v49  ;;  %v5909_v49 = vld [vmem:[%s7954_s3 + $0x70] sm:$0xff]  }
 0x113   :  { %v653_v43 = vcombine.high %v652_v27, %v652_v27  ;;  %v5086_v44 = vrot.slane %v652_v27, 9  ;;  %v542_v47 = vmax.f32 %v6321_v4, %v470_v28  ;;  %v1427_v51 = vunpack.c.l.b16 %v6403_v30  ;;  %5526 = vmatpush3.bf16.msra.mxu0 %v5904_v57  ;;  %5465 = vmatprep.subr.bf16.mxu1 %v5905_v0 }
 0x114   :  { %v5085_v52 = vrot.slane %v645_v31, 9  ;;  %v1190_v40 = vmax.f32 %v644_v23, %v5084_v34  ;;  %v668_v53 = vrot.slane %v541_v29, %v6293_v45  ;;  %v1426_v4 = vunpack.c.l.b16 %v6397_v26  ;;  %v5908_v34 = vld [vmem:[%s7954_s3 + $0x198] sm:$0xff]  }
 0x115   :  { %v6418_v56 = vpop.f32.mrb[16].mxu0  ;;  %v5087_v60 = vrot.slane %v653_v43, 9  ;;  %v1192_v61 = vmax.f32 %v652_v27, %v5086_v44  ;;  %v676_v62 = vrot.slane %v542_v47, %v6293_v45  ;;  %v1451_v1 = vrot.slane %v1427_v51, 7  ;;  %v5907_v27 = vld [vmem:[%s7954_s3 + $0x1d8] sm:$0xff]  }
 0x116   :  { %v6425_v63 = vpop.f32.mrb[17].mxu0  ;;  %v1191_v9 = vmax.f32 %v645_v31, %v5085_v52  ;;  %v1262_v5 = vmax.f32 %v1190_v40, 0.0  ;;  %v669_v12 = vcombine.high %v668_v53, %v668_v53  ;;  %v5090_v23 = vrot.slane %v668_v53, 9  ;;  %5466 = vmatpush3.bf16.msra.mxu1 %v5906_v14  ;;  %5527 = vmatprep.subr.bf16.mxu0 %v5907_v27 }
 0x117   :  { %v6432_v13 = vpop.f32.mrb[18].mxu0  ;;  %v1193_v18 = vmax.f32 %v653_v43, %v5087_v60  ;;  %v1264_v19 = vmax.f32 %v1192_v61, 0.0  ;;  %v677_v22 = vcombine.high %v676_v62, %v676_v62  ;;  %v473_v31 = vcombine.high %v6406_v38, %v6406_v38  ;;  %5528 = vmatpush3.bf16.msra.mxu0 %v5908_v34  ;;  %v5910_v61 = vld [vmem:[%s7954_s3 + $0x30] sm:$0xff]   ;;  %5467 = vmatprep.subr.bf16.mxu1 %v5909_v49 }
 0x118   :  { %v6437_v26 = vpop.f32.mrb[19].mxu0  ;;  %v1263_v28 = vmax.f32 %v1191_v9, 0.0  ;;  %v1334_v29 = vpack.c.bf16 %v1262_v5, %v1262_v5  ;;  %v5091_v3 = vrot.slane %v669_v12, 9  ;;  %v5092_v44 = vrot.slane %v676_v62, 9 }
 0x119   :  { %v1265_v39 = vmax.f32 %v1193_v18, 0.0  ;;  %v6447_v43 = vpack.c.bf16 %v1264_v19, %v1264_v19  ;;  %v5093_v47 = vrot.slane %v677_v22, 9  ;;  %v1196_v57 = vmax.f32 %v668_v53, %v5090_v23  ;;  %v5911_v18 = vld [vmem:[%s7954_s3 + $0x1e0] sm:$0xff]  }
 0x11a   :  { %v6452_v52 = vpack.c.bf16 %v1263_v28, %v1263_v28  ;;  %v1496_v40 = vunpack.c.l.b16 %v1334_v29  ;;  %v1197_v60 = vmax.f32 %v669_v12, %v5091_v3  ;;  %v6458_v0 = vsel %vm1447_vm0, %v1451_v1, %v1426_v4  ;;  %5468 = vmatpush3.bf16.msra.mxu1 %v5910_v61  ;;  %v5912_v4 = vld [vmem:[%s7954_s3 + $0x1a0] sm:$0xff]   ;;  %5529 = vmatprep.subr.bf16.mxu0 %v5911_v18  ;;  %v5913_v3 = vld [vmem:[%s7954_s3 + $0x78] sm:$0xff]   ;;  %v5915_v18 = vld [vmem:[%s7954_s3 + $0x1e8] sm:$0xff]  }
 0x11b   :  { %8022 = vst [vmem:[#allocation7_spill] sm:$0xff] %v6458_v0  ;;  %v1337_v9 = vpack.c.bf16 %v1265_v39, %v1265_v39  ;;  %v1198_v5 = vmax.f32 %v676_v62, %v5092_v44  ;;  %v1199_v14 = vmax.f32 %v677_v22, %v5093_v47  ;;  %v1268_v12 = vmax.f32 %v1196_v57, 0.0  ;;  %5530 = vmatpush3.bf16.msra.mxu0 %v5912_v4  ;;  %v5914_v57 = vld [vmem:[%s7954_s3 + $0x38] sm:$0xff]  }
 0x11c   :  { %v1509_v19 = vrot.slane %v1496_v40, 7  ;;  %v7962_v53 = vunpack.c.l.b16 %v6452_v52  ;;  %v1269_v23 = vmax.f32 %v1197_v60, 0.0  ;;  %v7966_v62 = vunpack.c.l.b16 %v6447_v43  ;;  %5469 = vmatprep.subr.bf16.mxu1 %v5913_v3  ;;  %5531 = vmatprep.subr.bf16.mxu0 %v5915_v18 }
 0x11d   :  { %v6464_v27 = vpop.f32.mrb[20].mxu0  ;;  %v1676_v1 = vunpack.c.l.b16 %v1337_v9  ;;  %v1270_v22 = vmax.f32 %v1198_v5, 0.0  ;;  %v1271_v28 = vmax.f32 %v1199_v14, 0.0  ;;  %v1340_v44 = vpack.c.bf16 %v1268_v12, %v1268_v12 }
 0x11e   :  { %v6470_v29 = vpop.f32.mrb[21].mxu0  ;;  %v6478_v34 = vsel %vm1447_vm0, %v1509_v19, %v7967_v42  ;;  %v1569_v39 = vrot.slane %v7962_v53, 7  ;;  %v1341_v47 = vpack.c.bf16 %v1269_v23, %v1269_v23  ;;  %v545_v5 = vmax.f32 %v6366_v2, %v473_v31  ;;  %5470 = vmatpush3.bf16.msra.mxu1 %v5914_v57  ;;  %v5916_v31 = vld [vmem:[%s7954_s3 + $0x1a8] sm:$0xff]  }
 0x11f   :  { %8023 = vst [vmem:[#allocation8_spill] sm:$0xff] %v6478_v34  ;;  %v6482_v49 = vpop.f32.mrb[22].mxu0  ;;  %v1689_v60 = vrot.slane %v1676_v1, 7  ;;  %v1342_v61 = vpack.c.bf16 %v1270_v22, %v1270_v22  ;;  %v1343_v9 = vpack.c.bf16 %v1271_v28, %v1271_v28  ;;  %v1497_v12 = vunpack.c.l.b16 %v1340_v44  ;;  %5532 = vmatpush3.bf16.msra.mxu0 %v5916_v31 }
 0x120   :  { %v6488_v14 = vpop.f32.mrb[23].mxu0  ;;  %v6494_v19 = vsel %vm1447_vm0, %v1569_v39, %v1496_v40  ;;  %v1557_v23 = vunpack.c.l.b16 %v1341_v47  ;;  %v319_v4 = vadd.f32 %v6282_v33, %v6344_v46  ;;  %v700_v44 = vrot.slane %v545_v5, %v6293_v45 }
 0x121   :  { %8024 = vst [vmem:[#allocation9_spill] sm:$0xff] %v6494_v19  ;;  %v6504_v1 = vsel %vm1447_vm0, %v1689_v60, %v7966_v62  ;;  %v1617_v40 = vunpack.c.l.b16 %v1342_v61  ;;  %v1677_v28 = vunpack.c.l.b16 %v1343_v9  ;;  %v1511_v46 = vrot.slane %v1497_v12, 7 }
 0x122   :  { %8025 = vst [vmem:[#allocation10_spill] sm:$0xff] %v6504_v1  ;;  %v1571_v39 = vrot.slane %v1557_v23, 7  ;;  %v471_v32 = vcombine.high %v319_v4, %v319_v4  ;;  %v543_v60 = vmax.f32 %v319_v4, %v472_v24  ;;  %v701_v18 = vcombine.high %v700_v44, %v700_v44 }
 0x123   :  { %v1631_v47 = vrot.slane %v1617_v40, 7  ;;  %v1691_v57 = vrot.slane %v1677_v28, 7  ;;  %v6517_v61 = vsel %vm1447_vm0, %v1511_v46, %v1427_v51  ;;  %v5098_v3 = vrot.slane %v700_v44, 9 }
 0x124   :  { %8026 = vst [vmem:[#allocation11_spill] sm:$0xff] %v6517_v61  ;;  %v6520_v9 = vsel %vm1447_vm0, %v1571_v39, %v1497_v12  ;;  %v544_v24 = vmax.f32 %v471_v32, %v6406_v38  ;;  %v5099_v12 = vrot.slane %v701_v18, 9  ;;  %v684_v28 = vrot.slane %v543_v60, %v6293_v45 }
 0x125   :  { %8027 = vst [vmem:[#allocation12_spill] sm:$0xff] %v6520_v9  ;;  %v6522_v22 = vpop.f32.mrb[24].mxu0  ;;  %v6525_v5 = vsel %vm1447_vm0, %v1631_v47, %v1557_v23  ;;  %v1204_v4 = vmax.f32 %v700_v44, %v5098_v3  ;;  %v6542_v23 = vpack.c.bf16 %v1260_v11, %v1260_v11  ;;  %v6546_v32 = vsel %vm1447_vm0, %v1691_v57, %v1617_v40 }
 0x126   :  { %8028 = vst [vmem:[#allocation13_spill] sm:$0xff] %v6525_v5  ;;  %v6532_v30 = vpop.f32.mrb[25].mxu0  ;;  %v692_v39 = vrot.slane %v544_v24, %v6293_v45  ;;  %8029 = vst [vmem:[#allocation14_spill] sm:$0xff] %v6546_v32  ;;  %v332_v38 = vadd.f32 %v6282_v33, %v6376_v10  ;;  %v1205_v3 = vmax.f32 %v701_v18, %v5099_v12  ;;  %v5094_v51 = vrot.slane %v684_v28, 9 }
 0x127   :  { %v6537_v46 = vpop.f32.mrb[26].mxu0  ;;  %v1276_v44 = vmax.f32 %v1204_v4, 0.0  ;;  %v685_v60 = vcombine.high %v684_v28, %v684_v28  ;;  %v340_v11 = vadd.f32 %v6368_v6, %v6282_v33  ;;  %v6560_v18 = vadd.f32 %v6379_v15, %v6282_v33 }
 0x128   :  { %v6550_v47 = vpop.f32.mrb[27].mxu0  ;;  %v693_v31 = vcombine.high %v692_v39, %v692_v39  ;;  %v5096_v2 = vrot.slane %v692_v39, 9  ;;  %v1277_v24 = vmax.f32 %v1205_v3, 0.0  ;;  %v1200_v53 = vmax.f32 %v684_v28, %v5094_v51 }
 0x129   :  { %v6556_v40 = vpack.c.bf16 %v1276_v44, %v1276_v44  ;;  %v5095_v57 = vrot.slane %v685_v60, 9  ;;  %v474_v37 = vcombine.high %v332_v38, %v332_v38  ;;  %v476_v42 = vcombine.high %v340_v11, %v340_v11 }
 0x12a   :  { %v5097_v10 = vrot.slane %v693_v31, 9  ;;  %v1202_v50 = vmax.f32 %v692_v39, %v5096_v2  ;;  %v1349_v12 = vpack.c.bf16 %v1277_v24, %v1277_v24  ;;  %v1272_v55 = vmax.f32 %v1200_v53, 0.0 }
 0x12b   :  { %v7977_v4 = vunpack.c.l.b16 %v6556_v40  ;;  %v1201_v59 = vmax.f32 %v685_v60, %v5095_v57  ;;  %v547_v62 = vmax.f32 %v474_v37, %v340_v11  ;;  %v335_v53 = vadd.f32 %v6282_v33, %v6389_v20 }
 0x12c   :  { %v1203_v3 = vmax.f32 %v693_v31, %v5097_v10  ;;  %v1274_v44 = vmax.f32 %v1202_v50, 0.0  ;;  %v1678_v2 = vunpack.c.l.b16 %v1349_v12  ;;  %v1344_v39 = vpack.c.bf16 %v1272_v55, %v1272_v55 }
 0x12d   :  { %v6563_v58 = vpop.f32.mrb[28].mxu0  ;;  %v1273_v28 = vmax.f32 %v1201_v59, 0.0  ;;  %v716_v60 = vrot.slane %v547_v62, %v6293_v45  ;;  %v1633_v37 = vrot.slane %v7977_v4, 7  ;;  %v548_v6 = vmax.f32 %v335_v53, %v476_v42 }
 0x12e   :  { %v6566_v51 = vpop.f32.mrb[29].mxu0  ;;  %v1275_v24 = vmax.f32 %v1203_v3, 0.0  ;;  %v1346_v5 = vpack.c.bf16 %v1274_v44, %v1274_v44  ;;  %v6577_v50 = vrot.slane %v1678_v2, 7  ;;  %v1428_v3 = vunpack.c.l.b16 %v1344_v39 }
 0x12f   :  { %v6568_v15 = vpop.f32.mrb[30].mxu0  ;;  %v1345_v31 = vpack.c.bf16 %v1273_v28, %v1273_v28  ;;  %v717_v10 = vcombine.high %v716_v60, %v716_v60  ;;  %v5102_v12 = vrot.slane %v716_v60, 9  ;;  %v475_v44 = vcombine.high %v335_v53, %v335_v53 }
 0x130   :  { %v6573_v57 = vpop.f32.mrb[31].mxu0  ;;  %v1347_v55 = vpack.c.bf16 %v1275_v24, %v1275_v24  ;;  %v1498_v11 = vunpack.c.l.b16 %v1346_v5  ;;  %v724_v2 = vrot.slane %v548_v6, %v6293_v45  ;;  %v6584_v28 = vadd.f32 %v6418_v56, %v6282_v33 }
 0x131   :  { %v1429_v62 = vunpack.c.l.b16 %v1345_v31  ;;  %v5103_v9 = vrot.slane %v717_v10, 9  ;;  %v1208_v0 = vmax.f32 %v716_v60, %v5102_v12  ;;  %v546_v4 = vmax.f32 %v332_v38, %v475_v44 }
 0x132   :  { %v1513_v20 = vrot.slane %v1498_v11, 7  ;;  %v1558_v61 = vunpack.c.l.b16 %v1347_v55  ;;  %v725_v56 = vcombine.high %v724_v2, %v724_v2  ;;  %v5104_v44 = vrot.slane %v724_v2, 9 }
 0x133   :  { %v1453_v36 = vrot.slane %v1429_v62, 7  ;;  %v1209_v53 = vmax.f32 %v717_v10, %v5103_v9  ;;  %v1280_v6 = vmax.f32 %v1208_v0, 0.0  ;;  %v708_v60 = vrot.slane %v546_v4, %v6293_v45 }
 0x134   :  { %v6589_v5 = vsel %vm1447_vm0, %v1513_v20, %v1429_v62  ;;  %v1573_v39 = vrot.slane %v1558_v61, 7  ;;  %v6592_v42 = vsel %vm1447_vm0, %v1633_v37, %v1558_v61  ;;  %v5105_v20 = vrot.slane %v725_v56, 9 }
 0x135   :  { %v6586_v24 = vpop.f32.mrb[32].mxu0  ;;  %8030 = vst [vmem:[#allocation15_spill] sm:$0xff] %v6589_v5  ;;  %8031 = vst [vmem:[#allocation16_spill] sm:$0xff] %v6592_v42  ;;  %v6597_v38 = vsel %vm1447_vm0, %v1453_v36, %v1428_v3  ;;  %v1281_v9 = vmax.f32 %v1209_v53, 0.0  ;;  %v1352_v4 = vpack.c.bf16 %v1280_v6, %v1280_v6  ;;  %v709_v10 = vcombine.high %v708_v60, %v708_v60 }
 0x136   :  { %v6594_v31 = vpop.f32.mrb[33].mxu0  ;;  %8032 = vst [vmem:[#allocation17_spill] sm:$0xff] %v6597_v38  ;;  %v6603_v12 = vsel %vm1447_vm0, %v1573_v39, %v1498_v11  ;;  %v5100_v11 = vrot.slane %v708_v60, 9  ;;  %v348_v61 = vadd.f32 %v6282_v33, %v6425_v63  ;;  %v6619_v53 = vadd.f32 %v6432_v13, %v6282_v33  ;;  %v5917_v63 = vld [vmem:[%s7954_s3 + $0xc0] sm:$0xff]  }
 0x137   :  { %v6600_v55 = vpop.f32.mrb[34].mxu0  ;;  %8033 = vst [vmem:[#allocation18_spill] sm:$0xff] %v6603_v12  ;;  %v1353_v3 = vpack.c.bf16 %v1281_v9, %v1281_v9  ;;  %v1499_v39 = vunpack.c.l.b16 %v1352_v4  ;;  %v5101_v62 = vrot.slane %v709_v10, 9  ;;  %v1210_v38 = vmax.f32 %v724_v2, %v5104_v44  ;;  %5477 = vmatprep.subr.bf16.mxu1 %v5917_v63 }
 0x138   :  { %v6609_v37 = vpop.f32.mrb[35].mxu0  ;;  %v1206_v36 = vmax.f32 %v708_v60, %v5100_v11  ;;  %v1211_v5 = vmax.f32 %v725_v56, %v5105_v20  ;;  %v478_v12 = vcombine.high %v348_v61, %v348_v61  ;;  %v481_v9 = vcombine.high %v6619_v53, %v6619_v53 }
 0x139   :  { %v1559_v59 = vunpack.c.l.b16 %v1353_v3  ;;  %v1515_v0 = vrot.slane %v1499_v39, 7  ;;  %v1207_v6 = vmax.f32 %v709_v10, %v5101_v62  ;;  %v1282_v42 = vmax.f32 %v1210_v38, 0.0  ;;  %v5920_v38 = vld [vmem:[%s7954_s3 + $0x1b0] sm:$0xff]  }
 0x13a   :  { %v1278_v4 = vmax.f32 %v1206_v36, 0.0  ;;  %v1283_v19 = vmax.f32 %v1211_v5, 0.0  ;;  %v549_v3 = vmax.f32 %v6560_v18, %v478_v12  ;;  %v552_v2 = vmax.f32 %v6584_v28, %v481_v9  ;;  %v5919_v5 = vld [vmem:[%s7954_s3 + $0x1f0] sm:$0xff]  }
 0x13b   :  { %v1575_v32 = vrot.slane %v1559_v59, 7  ;;  %v1279_v13 = vmax.f32 %v1207_v6, 0.0  ;;  %v351_v60 = vadd.f32 %v6282_v33, %v6437_v26  ;;  %v1354_v10 = vpack.c.bf16 %v1282_v42, %v1282_v42  ;;  %5533 = vmatprep.subr.bf16.mxu0 %v5919_v5 }
 0x13c   :  { %v1350_v62 = vpack.c.bf16 %v1278_v4, %v1278_v4  ;;  %v1355_v36 = vpack.c.bf16 %v1283_v19, %v1283_v19  ;;  %v732_v11 = vrot.slane %v549_v3, %v6293_v45  ;;  %v756_v26 = vrot.slane %v552_v2, %v6293_v45  ;;  %5534 = vmatpush3.bf16.msra.mxu0 %v5920_v38  ;;  %v5923_v2 = vld [vmem:[%s7954_s3 + $0x1f8] sm:$0xff]  }
 0x13d   :  { %v6631_v56 = vsel %vm1447_vm0, %v1575_v32, %v1499_v39  ;;  %v1351_v12 = vpack.c.bf16 %v1279_v13, %v1279_v13  ;;  %v479_v44 = vcombine.high %v351_v60, %v351_v60  ;;  %v1619_v20 = vunpack.c.l.b16 %v1354_v10  ;;  %5535 = vmatprep.subr.bf16.mxu0 %v5923_v2 }
 0x13e   :  { %8034 = vst [vmem:[#allocation19_spill] sm:$0xff] %v6631_v56  ;;  %v1430_v32 = vunpack.c.l.b16 %v1350_v62  ;;  %v1679_v39 = vunpack.c.l.b16 %v1355_v36  ;;  %v8035_v19 = vcombine.high %v6560_v18, %v6560_v18  ;;  %v733_v9 = vcombine.high %v732_v11, %v732_v11  ;;  %v5924_v62 = vld [vmem:[%s7954_s3 + $0x1b8] sm:$0xff]  }
 0x13f   :  { %v1431_v6 = vunpack.c.l.b16 %v1351_v12  ;;  %v5106_v4 = vrot.slane %v732_v11, 9  ;;  %v757_v63 = vcombine.high %v756_v26, %v756_v26  ;;  %v1635_v34 = vrot.slane %v1619_v20, 7 }
 0x140   :  { %v550_v42 = vmax.f32 %v8035_v19, %v351_v60  ;;  %v1695_v13 = vrot.slane %v1679_v39, 7  ;;  %v5112_v1 = vrot.slane %v756_v26, 9  ;;  %v551_v3 = vmax.f32 %v348_v61, %v479_v44  ;;  %5536 = vmatpush3.bf16.msra.mxu0 %v5924_v62 }
 0x141   :  { %v1455_v18 = vrot.slane %v1431_v6, 7  ;;  %v6651_v60 = vsel %vm1447_vm0, %v1515_v0, %v1431_v6  ;;  %v5107_v10 = vrot.slane %v733_v9, 9  ;;  %v1212_v36 = vmax.f32 %v732_v11, %v5106_v4 }
 0x142   :  { %8036 = vst [vmem:[#allocation20_spill] sm:$0xff] %v6651_v60  ;;  %v6654_v5 = vsel %vm1447_vm0, %v1635_v34, %v1559_v59  ;;  %v6657_v38 = vsel %vm1447_vm0, %v1695_v13, %v1619_v20  ;;  %v5113_v61 = vrot.slane %v757_v63, 9  ;;  %v1218_v12 = vmax.f32 %v756_v26, %v5112_v1 }
 0x143   :  { %8037 = vst [vmem:[#allocation21_spill] sm:$0xff] %v6654_v5  ;;  %8038 = vst [vmem:[#allocation22_spill] sm:$0xff] %v6657_v38  ;;  %v8039_v44 = vunpack.c.l.b16 %v6556_v40  ;;  %v6666_v0 = vsel %vm1447_vm0, %v1455_v18, %v1430_v32  ;;  %v1213_v59 = vmax.f32 %v733_v9, %v5107_v10  ;;  %v1284_v26 = vmax.f32 %v1212_v36, 0.0 }
 0x144   :  { %8041 = vst [vmem:[#allocation24_spill] sm:$0xff] %v6666_v0  ;;  %v1219_v32 = vmax.f32 %v757_v63, %v5113_v61  ;;  %v1290_v20 = vmax.f32 %v1218_v12, 0.0  ;;  %v740_v19 = vrot.slane %v550_v42, %v6293_v45  ;;  %v748_v6 = vrot.slane %v551_v3, %v6293_v45 }
 0x145   :  { %v6663_v39 = vsel %vm1447_vm0, %v6577_v50, %v8039_v44  ;;  %v5927_v50 = vld [vmem:[%s7954_s3 + $0x2c0] sm:$0xff]   ;;  %v8042_v4 = vunpack.c.l.b16 %v6385_v17  ;;  %v8043_v2 = vunpack.c.l.b16 %v6447_v43  ;;  %v1285_v9 = vmax.f32 %v1213_v59, 0.0 }
 0x146   :  { %8040 = vst [vmem:[#allocation23_spill] sm:$0xff] %v6663_v39  ;;  %v1356_v18 = vpack.c.bf16 %v1284_v26, %v1284_v26  ;;  %5565 = vmatprep.subr.bf16.mxu0 %v5927_v50  ;;  %v1291_v10 = vmax.f32 %v1219_v32, 0.0  ;;  %v741_v36 = vcombine.high %v740_v19, %v740_v19  ;;  %v749_v44 = vcombine.high %v748_v6, %v748_v6 }
 0x147   :  { %v6683_v13 = vrot.slane %v8042_v4, 7  ;;  %v6687_v62 = vrot.slane %v8043_v2, 7  ;;  %v364_v63 = vadd.f32 %v6282_v33, %v6470_v29  ;;  %v480_v42 = vcombine.high %v6584_v28, %v6584_v28 }
 0x148   :  { %v1357_v3 = vpack.c.bf16 %v1285_v9, %v1285_v9  ;;  %v5108_v17 = vrot.slane %v740_v19, 9  ;;  %v5110_v61 = vrot.slane %v748_v6, 9  ;;  %v6693_v12 = vpack.c.bf16 %v1290_v20, %v1290_v20 }
 0x149   :  { %v5109_v43 = vrot.slane %v741_v36, 9  ;;  %v5111_v4 = vrot.slane %v749_v44, 9  ;;  %v6697_v59 = vadd.f32 %v6464_v27, %v6282_v33  ;;  %v1432_v26 = vunpack.c.l.b16 %v1356_v18 }
 0x14a   :  { %v1433_v50 = vunpack.c.l.b16 %v1357_v3  ;;  %v1214_v32 = vmax.f32 %v740_v19, %v5108_v17  ;;  %v1216_v2 = vmax.f32 %v748_v6, %v5110_v61  ;;  %v6699_v11 = vpack.c.bf16 %v1291_v10, %v1291_v10 }
 0x14b   :  { %v1215_v29 = vmax.f32 %v741_v36, %v5109_v43  ;;  %v1217_v1 = vmax.f32 %v749_v44, %v5111_v4  ;;  %v482_v28 = vcombine.high %v364_v63, %v364_v63  ;;  %v553_v20 = vmax.f32 %v480_v42, %v364_v63 }
 0x14c   :  { %v1457_v9 = vrot.slane %v1433_v50, 7  ;;  %v1286_v34 = vmax.f32 %v1214_v32, 0.0  ;;  %v1288_v40 = vmax.f32 %v1216_v2, 0.0  ;;  %v484_v38 = vcombine.high %v6697_v59, %v6697_v59 }
 0x14d   :  { %v1287_v5 = vmax.f32 %v1215_v29, 0.0  ;;  %v1289_v0 = vmax.f32 %v1217_v1, 0.0  ;;  %v554_v27 = vmax.f32 %v6619_v53, %v482_v28  ;;  %v764_v10 = vrot.slane %v553_v20, %v6293_v45 }
 0x14e   :  { %v6705_v18 = vsel %vm1447_vm0, %v1457_v9, %v1432_v26  ;;  %v1358_v19 = vpack.c.bf16 %v1286_v34, %v1286_v34  ;;  %v1360_v6 = vpack.c.bf16 %v1288_v40, %v1288_v40  ;;  %v375_v63 = vadd.f32 %v6482_v49, %v6282_v33 }
 0x14f   :  { %8044 = vst [vmem:[#allocation25_spill] sm:$0xff] %v6705_v18  ;;  %v1359_v36 = vpack.c.bf16 %v1287_v5, %v1287_v5  ;;  %v1361_v44 = vpack.c.bf16 %v1289_v0, %v1289_v0  ;;  %v772_v3 = vrot.slane %v554_v27, %v6293_v45  ;;  %v765_v17 = vcombine.high %v764_v10, %v764_v10 }
 0x150   :  { %v1500_v1 = vunpack.c.l.b16 %v1358_v19  ;;  %v1620_v42 = vunpack.c.l.b16 %v1360_v6  ;;  %v5114_v61 = vrot.slane %v764_v10, 9 }
 0x151   :  { %v1560_v43 = vunpack.c.l.b16 %v1359_v36  ;;  %v1680_v53 = vunpack.c.l.b16 %v1361_v44  ;;  %v773_v4 = vcombine.high %v772_v3, %v772_v3  ;;  %v5116_v26 = vrot.slane %v772_v3, 9 }
 0x152   :  { %v1517_v32 = vrot.slane %v1500_v1, 7  ;;  %v1637_v34 = vrot.slane %v1620_v42, 7  ;;  %v5115_v40 = vrot.slane %v765_v17, 9  ;;  %v1220_v2 = vmax.f32 %v764_v10, %v5114_v61 }
 0x153   :  { %v1577_v29 = vrot.slane %v1560_v43, 7  ;;  %v1697_v5 = vrot.slane %v1680_v53, 7  ;;  %v5117_v0 = vrot.slane %v773_v4, 9  ;;  %v1222_v28 = vmax.f32 %v772_v3, %v5116_v26 }
 0x154   :  { %v6712_v9 = vsel %vm1447_vm0, %v1517_v32, %v1433_v50  ;;  %v6715_v49 = vsel %vm1447_vm0, %v1637_v34, %v1560_v43  ;;  %v1221_v20 = vmax.f32 %v765_v17, %v5115_v40  ;;  %v1292_v27 = vmax.f32 %v1220_v2, 0.0 }
 0x155   :  { %8045 = vst [vmem:[#allocation26_spill] sm:$0xff] %v6712_v9  ;;  %8046 = vst [vmem:[#allocation27_spill] sm:$0xff] %v6715_v49  ;;  %v6718_v19 = vsel %vm1447_vm0, %v1577_v29, %v1500_v1  ;;  %v6721_v6 = vsel %vm1447_vm0, %v1697_v5, %v1620_v42  ;;  %v1223_v36 = vmax.f32 %v773_v4, %v5117_v0  ;;  %v8000_v44 = vunpack.c.l.b16 %v6699_v11 }
 0x156   :  { %8047 = vst [vmem:[#allocation28_spill] sm:$0xff] %v6718_v19  ;;  %8048 = vst [vmem:[#allocation29_spill] sm:$0xff] %v6721_v6  ;;  %v1293_v3 = vmax.f32 %v1221_v20, 0.0  ;;  %v1294_v61 = vmax.f32 %v1222_v28, 0.0  ;;  %v1364_v17 = vpack.c.bf16 %v1292_v27, %v1292_v27  ;;  %v485_v53 = vcombine.high %v375_v63, %v375_v63 }
 0x157   :  { %v1295_v43 = vmax.f32 %v1223_v36, 0.0  ;;  %v367_v1 = vadd.f32 %v6282_v33, %v6488_v14  ;;  %v6736_v4 = vadd.f32 %v6522_v22, %v6282_v33  ;;  %v6740_v32 = vadd.f32 %v6282_v33, %v6532_v30 }
 0x158   :  { %v6730_v26 = vpack.c.bf16 %v1293_v3, %v1293_v3  ;;  %v6732_v42 = vpack.c.bf16 %v1294_v61, %v1294_v61  ;;  %v1501_v40 = vunpack.c.l.b16 %v1364_v17  ;;  %v557_v2 = vmax.f32 %v6697_v59, %v485_v53 }
 0x159   :  { %v1367_v34 = vpack.c.bf16 %v1295_v43, %v1295_v43  ;;  %v483_v29 = vcombine.high %v367_v1, %v367_v1  ;;  %v555_v28 = vmax.f32 %v367_v1, %v484_v38  ;;  %v6748_v22 = vrot.slane %v8000_v44, 7 }
 0x15a   :  { %v8001_v14 = vunpack.c.l.b16 %v6730_v26  ;;  %v1621_v0 = vunpack.c.l.b16 %v6732_v42  ;;  %v796_v20 = vrot.slane %v557_v2, %v6293_v45  ;;  %v6753_v27 = vrot.slane %v1501_v40, 7 }
 0x15b   :  { %v556_v33 = vmax.f32 %v483_v29, %v375_v63  ;;  %v1681_v59 = vunpack.c.l.b16 %v1367_v34  ;;  %v780_v36 = vrot.slane %v555_v28, %v6293_v45  ;;  %v486_v3 = vcombine.high %v6740_v32, %v6740_v32 }
 0x15c   :  { %v1579_v38 = vrot.slane %v8001_v14, 7  ;;  %v797_v61 = vcombine.high %v796_v20, %v796_v20  ;;  %v5122_v43 = vrot.slane %v796_v20, 9  ;;  %v6761_v53 = vrot.slane %v1621_v0, 7 }
 0x15d   :  { %v788_v17 = vrot.slane %v556_v33, %v6293_v45  ;;  %v781_v63 = vcombine.high %v780_v36, %v780_v36  ;;  %v5118_v1 = vrot.slane %v780_v36, 9  ;;  %v559_v42 = vmax.f32 %v486_v3, %v6736_v4 }
 0x15e   :  { %8049 = vst [vmem:[#allocation30_spill] sm:$0xff] %v6761_v53  ;;  %v5123_v2 = vrot.slane %v797_v61, 9  ;;  %v1228_v34 = vmax.f32 %v796_v20, %v5122_v43  ;;  %v1699_v50 = vrot.slane %v1681_v59, 7 }
 0x15f   :  { %v789_v29 = vcombine.high %v788_v17, %v788_v17  ;;  %v5120_v28 = vrot.slane %v788_v17, 9  ;;  %v5119_v10 = vrot.slane %v781_v63, 9  ;;  %v1224_v44 = vmax.f32 %v780_v36, %v5118_v1 }
 0x160   :  { %v812_v5 = vrot.slane %v559_v42, %v6293_v45  ;;  %v1229_v14 = vmax.f32 %v797_v61, %v5123_v2  ;;  %v1300_v30 = vmax.f32 %v1228_v34, 0.0  ;;  %v6768_v61 = vsel %vm1447_vm0, %v1579_v38, %v1501_v40 }
 0x161   :  { %v5121_v19 = vrot.slane %v789_v29, 9  ;;  %v1226_v49 = vmax.f32 %v788_v17, %v5120_v28  ;;  %v1225_v33 = vmax.f32 %v781_v63, %v5119_v10  ;;  %v1296_v18 = vmax.f32 %v1224_v44, 0.0  ;;  %8050 = vst [vmem:[#allocation31_spill] sm:$0xff] %v6768_v61 }
 0x162   :  { %v813_v9 = vcombine.high %v812_v5, %v812_v5  ;;  %v5126_v6 = vrot.slane %v812_v5, 9  ;;  %v1301_v56 = vmax.f32 %v1229_v14, 0.0  ;;  %v1372_v60 = vpack.c.bf16 %v1300_v30, %v1300_v30 }
 0x163   :  { %v1227_v3 = vmax.f32 %v789_v29, %v5121_v19  ;;  %v1298_v39 = vmax.f32 %v1226_v49, 0.0  ;;  %v1297_v20 = vmax.f32 %v1225_v33, 0.0  ;;  %v1368_v43 = vpack.c.bf16 %v1296_v18, %v1296_v18 }
 0x164   :  { %v5127_v21 = vrot.slane %v813_v9, 9  ;;  %v1232_v59 = vmax.f32 %v812_v5, %v5126_v6  ;;  %v1373_v53 = vpack.c.bf16 %v1301_v56, %v1301_v56  ;;  %v1622_v36 = vunpack.c.l.b16 %v1372_v60 }
 0x165   :  { %v1299_v1 = vmax.f32 %v1227_v3, 0.0  ;;  %v6765_v42 = vpack.c.bf16 %v1298_v39, %v1298_v39  ;;  %v6770_v10 = vpack.c.bf16 %v1297_v20, %v1297_v20  ;;  %v1436_v49 = vunpack.c.l.b16 %v1368_v43  ;;  %v6781_v39 = vld [vmem:[%s7953_s2] ss:$0 sm:$0xff] }
 0x166   :  { %v1233_v44 = vmax.f32 %v813_v9, %v5127_v21  ;;  %v1304_v17 = vmax.f32 %v1232_v59, 0.0  ;;  %v1682_v14 = vunpack.c.l.b16 %v1373_v53  ;;  %v6775_v18 = vsel %vm1447_vm0, %v1699_v50, %v1621_v0 }
 0x167   :  { %v6772_v30 = vpack.c.bf16 %v1299_v1, %v1299_v1  ;;  %8051 = vst [vmem:[#allocation32_spill] sm:$0xff] %v6775_v18  ;;  %v8013_v56 = vunpack.c.l.b16 %v6770_v10  ;;  %v391_v21 = vadd.f32 %v6781_v39, %v6537_v46  ;;  %v6785_v9 = vrot.slane %v1622_v36, 7 }
 0x168   :  { %v1305_v60 = vmax.f32 %v1233_v44, 0.0  ;;  %v1376_v19 = vpack.c.bf16 %v1304_v17, %v1304_v17  ;;  %v1701_v6 = vrot.slane %v1682_v14, 7  ;;  %v383_v50 = vadd.f32 %v6781_v39, %v6550_v47 }
 0x169   :  { %v1461_v5 = vrot.slane %v8013_v56, 7  ;;  %v489_v46 = vcombine.high %v391_v21, %v391_v21  ;;  %v8052_v34 = vcombine.high %v6736_v4, %v6736_v4  ;;  %v6809_v3 = vadd.f32 %v6781_v39, %v6563_v58 }
 0x16a   :  { %v6793_v38 = vpack.c.bf16 %v1305_v60, %v1305_v60  ;;  %v1503_v53 = vunpack.c.l.b16 %v1376_v19  ;;  %v6796_v63 = vsel %vm1447_vm0, %v1701_v6, %v1622_v36  ;;  %v487_v2 = vcombine.high %v383_v50, %v383_v50 }
 0x16b   :  { %v560_v29 = vmax.f32 %v383_v50, %v8052_v34  ;;  %v6802_v28 = vsel %vm1447_vm0, %v1461_v5, %v1436_v49  ;;  %v396_v4 = vadd.f32 %v6781_v39, %v6566_v51  ;;  %v6821_v44 = vadd.f32 %v6781_v39, %v6568_v15 }
 0x16c   :  { %8053 = vst [vmem:[#allocation33_spill] sm:$0xff] %v6802_v28  ;;  %v6804_v47 = vrot.slane %v1503_v53, 7  ;;  %v1563_v33 = vunpack.c.l.b16 %v6793_v38  ;;  %v558_v43 = vmax.f32 %v6740_v32, %v487_v2  ;;  %v399_v58 = vadd.f32 %v6781_v39, %v6573_v57 }
 0x16d   :  { %v820_v59 = vrot.slane %v560_v29, %v6293_v45  ;;  %v490_v49 = vcombine.high %v396_v4, %v396_v4  ;;  %v493_v51 = vcombine.high %v6821_v44, %v6821_v44 }
 0x16e   :  { %v1583_v36 = vrot.slane %v1563_v33, 7  ;;  %v804_v17 = vrot.slane %v558_v43, %v6293_v45  ;;  %v491_v19 = vcombine.high %v399_v58, %v399_v58  ;;  %v562_v6 = vmax.f32 %v489_v46, %v399_v58 }
 0x16f   :  { %v821_v14 = vcombine.high %v820_v59, %v820_v59  ;;  %v5128_v32 = vrot.slane %v820_v59, 9  ;;  %v561_v2 = vmax.f32 %v391_v21, %v490_v49  ;;  %v564_v57 = vmax.f32 %v6809_v3, %v493_v51 }
 0x170   :  { %v6827_v60 = vsel %vm1447_vm0, %v1583_v36, %v1503_v53  ;;  %v805_v50 = vcombine.high %v804_v17, %v804_v17  ;;  %v5124_v5 = vrot.slane %v804_v17, 9  ;;  %v563_v34 = vmax.f32 %v396_v4, %v491_v19 }
 0x171   :  { %v5129_v15 = vrot.slane %v821_v14, 9  ;;  %v1234_v38 = vmax.f32 %v820_v59, %v5128_v32  ;;  %v836_v29 = vrot.slane %v562_v6, %v6293_v45  ;;  %v828_v36 = vrot.slane %v561_v2, %v6293_v45 }
 0x172   :  { %v5125_v43 = vrot.slane %v805_v50, 9  ;;  %v1230_v20 = vmax.f32 %v804_v17, %v5124_v5  ;;  %v852_v0 = vrot.slane %v564_v57, %v6293_v45  ;;  %v844_v46 = vrot.slane %v563_v34, %v6293_v45 }
 0x173   :  { %v1235_v56 = vmax.f32 %v821_v14, %v5129_v15  ;;  %v1306_v53 = vmax.f32 %v1234_v38, 0.0  ;;  %v837_v40 = vcombine.high %v836_v29, %v836_v29  ;;  %v829_v32 = vcombine.high %v828_v36, %v828_v36 }
 0x174   :  { %v1231_v58 = vmax.f32 %v805_v50, %v5125_v43  ;;  %v1302_v1 = vmax.f32 %v1230_v20, 0.0  ;;  %v5130_v49 = vrot.slane %v828_v36, 9  ;;  %v853_v4 = vcombine.high %v852_v0, %v852_v0 }
 0x175   :  { %v1307_v59 = vmax.f32 %v1235_v56, 0.0  ;;  %v1378_v21 = vpack.c.bf16 %v1306_v53, %v1306_v53  ;;  %v5136_v51 = vrot.slane %v852_v0, 9  ;;  %v5131_v5 = vrot.slane %v829_v32, 9 }
 0x176   :  { %v1303_v19 = vmax.f32 %v1231_v58, 0.0  ;;  %v1374_v6 = vpack.c.bf16 %v1302_v1, %v1302_v1  ;;  %v1236_v15 = vmax.f32 %v828_v36, %v5130_v49  ;;  %v5137_v38 = vrot.slane %v853_v4, 9 }
 0x177   :  { %v1379_v17 = vpack.c.bf16 %v1307_v59, %v1307_v59  ;;  %v1623_v14 = vunpack.c.l.b16 %v1378_v21  ;;  %v1242_v2 = vmax.f32 %v852_v0, %v5136_v51  ;;  %v1237_v50 = vmax.f32 %v829_v32, %v5131_v5 }
 0x178   :  { %v1375_v57 = vpack.c.bf16 %v1303_v19, %v1303_v19  ;;  %v1438_v18 = vunpack.c.l.b16 %v1374_v6  ;;  %v1308_v20 = vmax.f32 %v1236_v15, 0.0  ;;  %v1243_v56 = vmax.f32 %v853_v4, %v5137_v38 }
 0x179   :  { %v1643_v28 = vrot.slane %v1623_v14, 7  ;;  %v1683_v34 = vunpack.c.l.b16 %v1379_v17  ;;  %v1314_v43 = vmax.f32 %v1242_v2, 0.0  ;;  %v845_v1 = vcombine.high %v844_v46, %v844_v46 }
 0x17a   :  { %v1439_v53 = vunpack.c.l.b16 %v1375_v57  ;;  %v1309_v36 = vmax.f32 %v1237_v50, 0.0  ;;  %v1380_v21 = vpack.c.bf16 %v1308_v20, %v1308_v20  ;;  %v1315_v0 = vmax.f32 %v1243_v56, 0.0 }
 0x17b   :  { %v6837_v61 = vsel %vm1447_vm0, %v1643_v28, %v1563_v33  ;;  %v1703_v58 = vrot.slane %v1683_v34, 7  ;;  %v1386_v4 = vpack.c.bf16 %v1314_v43, %v1314_v43  ;;  %v5132_v15 = vrot.slane %v836_v29, 9 }
 0x17c   :  { %v1463_v49 = vrot.slane %v1439_v53, 7  ;;  %v6843_v51 = vsel %vm1447_vm0, %v6804_v47, %v1439_v53  ;;  %v1381_v33 = vpack.c.bf16 %v1309_v36, %v1309_v36  ;;  %v1440_v19 = vunpack.c.l.b16 %v1380_v21 }
 0x17d   :  { %v6846_v32 = vsel %vm1447_vm0, %v1703_v58, %v1623_v14  ;;  %v6850_v6 = vpack.c.bf16 %v1315_v0, %v1315_v0  ;;  %v1442_v5 = vunpack.c.l.b16 %v1386_v4  ;;  %v5133_v38 = vrot.slane %v837_v40, 9 }
 0x17e   :  { %v6853_v17 = vsel %vm1447_vm0, %v1463_v49, %v1438_v18  ;;  %v1441_v2 = vunpack.c.l.b16 %v1381_v33  ;;  %v5134_v34 = vrot.slane %v844_v46, 9  ;;  %v5135_v50 = vrot.slane %v845_v1, 9 }
 0x17f   :  { %v8017_v57 = vunpack.c.l.b16 %v6850_v6  ;;  %v1238_v20 = vmax.f32 %v836_v29, %v5132_v15  ;;  %v1239_v56 = vmax.f32 %v837_v40, %v5133_v38  ;;  %v420_v53 = vadd.f32 %v6781_v39, %v6586_v24 }
 0x180   :  { %v1465_v43 = vrot.slane %v1441_v2, 7  ;;  %v412_v58 = vadd.f32 %v6781_v39, %v6594_v31  ;;  %v1240_v36 = vmax.f32 %v844_v46, %v5134_v34  ;;  %v1241_v21 = vmax.f32 %v845_v1, %v5135_v50 }
 0x181   :  { %v1467_v18 = vrot.slane %v8017_v57, 7  ;;  %v1310_v0 = vmax.f32 %v1238_v20, 0.0  ;;  %v1311_v49 = vmax.f32 %v1239_v56, 0.0  ;;  %v496_v40 = vcombine.high %v420_v53, %v420_v53 }
 0x182   :  { %v6867_v4 = vsel %vm1447_vm0, %v1465_v43, %v1440_v19  ;;  %v494_v33 = vcombine.high %v412_v58, %v412_v58  ;;  %v1312_v38 = vmax.f32 %v1240_v36, 0.0  ;;  %v1313_v24 = vmax.f32 %v1241_v21, 0.0 }
 0x183   :  { %v6870_v29 = vsel %vm1447_vm0, %v1467_v18, %v1442_v5  ;;  %v1382_v59 = vpack.c.bf16 %v1310_v0, %v1310_v0  ;;  %v1383_v28 = vpack.c.bf16 %v1311_v49, %v1311_v49  ;;  %v8054_v31 = vcombine.high %v6809_v3, %v6809_v3 }
 0x184   :  { %v566_v1 = vmax.f32 %v6821_v44, %v494_v33  ;;  %v423_v19 = vadd.f32 %v6781_v39, %v6600_v55  ;;  %v1384_v5 = vpack.c.bf16 %v1312_v38, %v1312_v38  ;;  %v1385_v34 = vpack.c.bf16 %v1313_v24, %v1313_v24 }
 0x185   :  { %v565_v46 = vmax.f32 %v8054_v31, %v412_v58  ;;  %v1504_v50 = vunpack.c.l.b16 %v1382_v59  ;;  %v415_v20 = vadd.f32 %v6781_v39, %v6609_v37  ;;  %v1564_v56 = vunpack.c.l.b16 %v1383_v28 }
 0x186   :  { %v868_v18 = vrot.slane %v566_v1, %v6293_v45  ;;  %v497_v36 = vcombine.high %v423_v19, %v423_v19  ;;  %v1624_v3 = vunpack.c.l.b16 %v1384_v5  ;;  %v1684_v58 = vunpack.c.l.b16 %v1385_v34 }
 0x187   :  { %v860_v43 = vrot.slane %v565_v46, %v6293_v45  ;;  %v1525_v21 = vrot.slane %v1504_v50, 7  ;;  %v495_v0 = vcombine.high %v415_v20, %v415_v20  ;;  %v1585_v44 = vrot.slane %v1564_v56, 7 }
 0x188   :  { %v869_v33 = vcombine.high %v868_v18, %v868_v18  ;;  %v1645_v59 = vrot.slane %v1624_v3, 7  ;;  %v1705_v24 = vrot.slane %v1684_v58, 7  ;;  %v5140_v37 = vrot.slane %v868_v18, 9 }
 0x189   :  { %v861_v49 = vcombine.high %v860_v43, %v860_v43  ;;  %v5138_v55 = vrot.slane %v860_v43, 9  ;;  %v6885_v38 = vsel %vm1447_vm0, %v1525_v21, %v1441_v2  ;;  %v6888_v39 = vsel %vm1447_vm0, %v1585_v44, %v1504_v50 }
 0x18a   :  { %8055 = vst [vmem:[#allocation34_spill] sm:$0xff] %v6888_v39  ;;  %v5141_v46 = vrot.slane %v869_v33, 9  ;;  %v6893_v1 = vsel %vm1447_vm0, %v1645_v59, %v1564_v56  ;;  %v6896_v5 = vsel %vm1447_vm0, %v1705_v24, %v1624_v3  ;;  %v1246_v15 = vmax.f32 %v868_v18, %v5140_v37 }
 0x18b   :  { %v5139_v31 = vrot.slane %v861_v49, 9  ;;  %v1244_v34 = vmax.f32 %v860_v43, %v5138_v55  ;;  %v5191_v58 = vpack.c.b16 %v6870_v29, %v6896_v5  ;;  %v569_v28 = vmax.f32 %v420_v53, %v497_v36 }
 0x18c   :  { %v1247_v56 = vmax.f32 %v869_v33, %v5141_v46  ;;  %v8056_v3 = vunpack.c.l.b16 %v6765_v42  ;;  %v567_v2 = vmax.f32 %v415_v20, %v496_v40  ;;  %v568_v43 = vmax.f32 %v495_v0, %v423_v19 }
 0x18d   :  { %v1245_v44 = vmax.f32 %v861_v49, %v5139_v31  ;;  %v1316_v59 = vmax.f32 %v1244_v34, 0.0  ;;  %v1318_v55 = vmax.f32 %v1246_v15, 0.0  ;;  %v892_v57 = vrot.slane %v569_v28, %v6293_v45 }
 0x18e   :  { %v1521_v24 = vrot.slane %v8056_v3, 7  ;;  %v1319_v14 = vmax.f32 %v1247_v56, 0.0  ;;  %v8057_v50 = vunpack.c.l.b16 %v6772_v30  ;;  %v876_v18 = vrot.slane %v567_v2, %v6293_v45 }
 0x18f   :  { %v1317_v47 = vmax.f32 %v1245_v44, 0.0  ;;  %v1388_v21 = vpack.c.bf16 %v1316_v59, %v1316_v59  ;;  %v884_v53 = vrot.slane %v568_v43, %v6293_v45  ;;  %v1390_v36 = vpack.c.bf16 %v1318_v55, %v1318_v55 }
 0x190   :  { %v6911_v39 = vrot.slane %v8057_v50, 7  ;;  %v1391_v33 = vpack.c.bf16 %v1319_v14, %v1319_v14  ;;  %v893_v31 = vcombine.high %v892_v57, %v892_v57  ;;  %v5146_v19 = vrot.slane %v892_v57, 9 }
 0x191   :  { %v1389_v49 = vpack.c.bf16 %v1317_v47, %v1317_v47  ;;  %v1505_v37 = vunpack.c.l.b16 %v1388_v21  ;;  %v877_v15 = vcombine.high %v876_v18, %v876_v18  ;;  %v885_v20 = vcombine.high %v884_v53, %v884_v53 }
 0x192   :  { %v1625_v46 = vunpack.c.l.b16 %v1390_v36  ;;  %v1685_v28 = vunpack.c.l.b16 %v1391_v33  ;;  %v5147_v34 = vrot.slane %v893_v31, 9  ;;  %v1252_v50 = vmax.f32 %v892_v57, %v5146_v19 }
 0x193   :  { %v1565_v40 = vunpack.c.l.b16 %v1389_v49  ;;  %v1527_v0 = vrot.slane %v1505_v37, 7  ;;  %v5142_v56 = vrot.slane %v876_v18, 9  ;;  %v5143_v47 = vrot.slane %v877_v15, 9 }
 0x194   :  { %v8058_v2 = vunpack.c.l.b16 %v6850_v6  ;;  %v1647_v14 = vrot.slane %v1625_v46, 7  ;;  %v1707_v21 = vrot.slane %v1685_v28, 7  ;;  %v1253_v3 = vmax.f32 %v893_v31, %v5147_v34 }
 0x195   :  { %v1587_v44 = vrot.slane %v1565_v40, 7  ;;  %v1324_v49 = vmax.f32 %v1252_v50, 0.0  ;;  %v5144_v36 = vrot.slane %v884_v53, 9  ;;  %v8059_v28 = vunpack.c.l.b16 %v6342_v41 }
 0x196   :  { %v6918_v59 = vsel %vm1447_vm0, %v1527_v0, %v8058_v2  ;;  %v6926_v57 = vsel %vm1447_vm0, %v1647_v14, %v1565_v40  ;;  %v6929_v33 = vsel %vm1447_vm0, %v1707_v21, %v1625_v46  ;;  %v1325_v19 = vmax.f32 %v1253_v3, 0.0 }
 0x197   :  { %v6921_v43 = vsel %vm1447_vm0, %v1587_v44, %v1505_v37  ;;  %v5193_v37 = vpack.c.b16 %v6929_v33, %v6926_v57  ;;  %v1396_v0 = vpack.c.bf16 %v1324_v49, %v1324_v49  ;;  %v6941_v40 = vsel %vm1447_vm0, %v6383_v16, %v8059_v28 }
 0x198   :  { %v5192_v6 = vpack.c.b16 %v6921_v43, %v6918_v59  ;;  %v1397_v34 = vpack.c.bf16 %v1325_v19, %v1325_v19  ;;  %v5145_v46 = vrot.slane %v885_v20, 9  ;;  %v1248_v44 = vmax.f32 %v876_v18, %v5142_v56 }
 0x199   :  { %v1249_v50 = vmax.f32 %v877_v15, %v5143_v47  ;;  %v1626_v2 = vunpack.c.l.b16 %v1396_v0  ;;  %v1250_v14 = vmax.f32 %v884_v53, %v5144_v36  ;;  %v8060_v21 = vunpack.c.l.b16 %v6542_v23 }
 0x19a   :  { %v8061_v49 = vunpack.c.l.b16 %v6348_v48  ;;  %v1686_v31 = vunpack.c.l.b16 %v1397_v34  ;;  %v1251_v16 = vmax.f32 %v885_v20, %v5145_v46  ;;  %v1320_v28 = vmax.f32 %v1248_v44, 0.0 }
 0x19b   :  { %v6947_v3 = vsel %vm1447_vm0, %v6683_v13, %v8060_v21  ;;  %v1321_v19 = vmax.f32 %v1249_v50, 0.0  ;;  %v1322_v55 = vmax.f32 %v1250_v14, 0.0  ;;  %v8062_v18 = vunpack.c.l.b16 %v6693_v12 }
 0x19c   :  { %v1508_v41 = vsel %vm1447_vm0, %v6355_v54, %v8061_v49  ;;  %v8063_v23 = vunpack.c.l.b16 %v6699_v11  ;;  %v8064_v48 = vunpack.c.l.b16 %v6770_v10  ;;  %v1709_v54 = vrot.slane %v1686_v31, 7 }
 0x19d   :  { %v1460_v53 = vsel %vm1447_vm0, %v6748_v22, %v8062_v18  ;;  %v1323_v20 = vmax.f32 %v1251_v16, 0.0  ;;  %v1392_v56 = vpack.c.bf16 %v1320_v28, %v1320_v28  ;;  %v1393_v47 = vpack.c.bf16 %v1321_v19, %v1321_v19  ;;  %v8072_v16 = vld [vmem:[#allocation6_spill] sm:$0xff] }
 0x19e   :  { %v1520_v13 = vsel %vm1447_vm0, %v6753_v27, %v8063_v23  ;;  %v6964_v15 = vsel %vm1447_vm0, %v1521_v24, %v8064_v48  ;;  %v1649_v36 = vrot.slane %v1626_v2, 7  ;;  %v1394_v0 = vpack.c.bf16 %v1322_v55, %v1322_v55 }
 0x19f   :  { %v8065_v12 = vunpack.c.l.b16 %v6335_v25  ;;  %v8066_v11 = vunpack.c.l.b16 %v6338_v35  ;;  %v6975_v10 = vsel %vm1447_vm0, %v1709_v54, %v1626_v2  ;;  %v1395_v24 = vpack.c.bf16 %v1323_v20, %v1323_v20  ;;  %v8075_v54 = vld [vmem:[#allocation9_spill] sm:$0xff] }
 0x1a0   :  { %v1444_v31 = vunpack.c.l.b16 %v1392_v56  ;;  %v1445_v34 = vunpack.c.l.b16 %v1393_v47  ;;  %v1506_v46 = vunpack.c.l.b16 %v1394_v0  ;;  %v8067_v44 = vunpack.c.l.b16 %v6765_v42 }
 0x1a1   :  { %v1568_v22 = vsel %vm1447_vm0, %v6372_v7, %v8065_v12  ;;  %v1628_v27 = vsel %vm1447_vm0, %v6374_v8, %v8066_v11  ;;  %v8068_v55 = vunpack.c.l.b16 %v6452_v52  ;;  %v8069_v7 = vunpack.c.l.b16 %v6730_v26  ;;  %v8070_v8 = vld [vmem:[#allocation30_spill] sm:$0xff] }
 0x1a2   :  { %v1582_v25 = vsel %vm1447_vm0, %v6911_v39, %v8067_v44  ;;  %v1469_v2 = vrot.slane %v1445_v34, 7  ;;  %v1566_v14 = vunpack.c.l.b16 %v1395_v24  ;;  %v8071_v21 = vunpack.c.l.b16 %v6772_v30  ;;  %v8077_v24 = vld [vmem:[#allocation5_spill] sm:$0xff] }
 0x1a3   :  { %v6985_v35 = vsel %vm1447_vm0, %v6687_v62, %v8068_v55  ;;  %v1640_v50 = vsel %vm1447_vm0, %v8070_v8, %v8069_v7  ;;  %v5148_v39 = vpack.c.b16 %v1508_v41, %v6941_v40  ;;  %v1529_v52 = vrot.slane %v1506_v46, 7  ;;  %v8074_v41 = vld [vmem:[#allocation8_spill] sm:$0xff]  ;;  %v8080_v55 = vld [vmem:[#allocation23_spill] sm:$0xff] }
 0x1a4   :  { %v6995_v42 = vsel %vm1447_vm0, %v6785_v9, %v8071_v21  ;;  %v5149_v49 = vpack.c.b16 %v1628_v27, %v1568_v22  ;;  %v5150_v62 = vpack.c.b16 %v6947_v3, %v8072_v16  ;;  %v7001_v26 = vsel %vm1447_vm0, %v1469_v2, %v1444_v31  ;;  %v8073_v9 = vld [vmem:[#allocation10_spill] sm:$0xff]  ;;  %v8076_v22 = vld [vmem:[#allocation31_spill] sm:$0xff]  ;;  %v8081_v7 = vld [vmem:[#allocation20_spill] sm:$0xff] }
 0x1a5   :  { %v1589_v28 = vrot.slane %v1566_v14, 7  ;;  %v7004_v19 = vsel %vm1447_vm0, %v1649_v36, %v1566_v14  ;;  %v6135_v18 = vmov 1966171168   ;;  %v7007_v23 = vsel %vm1447_vm0, %v1529_v52, %v1445_v34  ;;  %v8078_v34 = vld [vmem:[#allocation33_spill] sm:$0xff]  ;;  %v8082_v8 = vld [vmem:[#allocation19_spill] sm:$0xff] }
 0x1a6   :  { %v1728_v30 = vunpack.c.l.s4 %v6135_v18  ;;  %v5152_v40 = vpack.c.b16 %v8073_v9, %v6985_v35  ;;  %v5160_v48 = vpack.c.b16 %v8074_v41, %v6947_v3  ;;  %v5161_v20 = vpack.c.b16 %v6985_v35, %v8075_v54 }
 0x1a7   :  { %v7016_v56 = vsel %vm1447_vm0, %v1589_v28, %v1506_v46  ;;  %v5194_v47 = vpack.c.b16 %v7007_v23, %v7001_v26  ;;  %v5172_v0 = vpack.c.b16 %v1520_v13, %v1460_v53  ;;  %v5173_v11 = vpack.c.b16 %v1640_v50, %v8076_v22  ;;  %v8079_v13 = vld [vmem:[#allocation16_spill] sm:$0xff] }
 0x1a8   :  { %v1729_v36 = vunpack.c.0.s8 %v1728_v30  ;;  %v5195_v12 = vpack.c.b16 %v7004_v19, %v7016_v56  ;;  %v5175_v27 = vpack.c.b16 %v1582_v25, %v6964_v15  ;;  %v5176_v3 = vpack.c.b16 %v6796_v63, %v6995_v42  ;;  %v5944_v26 = vld [vmem:[%s7954_s3 + $0x2a0] sm:$0xff]  }
 0x1a9   :  { %v5184_v46 = vpack.c.b16 %v6964_v15, %v8078_v34  ;;  %v5185_v44 = vpack.c.b16 %v6995_v42, %v1582_v25  ;;  %v5187_v53 = vpack.c.b16 %v6827_v60, %v6843_v51  ;;  %v5157_v35 = vpack.c.b16 %v8080_v55, %v8079_v13 }
 0x1aa   :  { %v7027_v31 = vsub.s32 %v1729_v36, %v8077_v24  ;;  %v5168_v50 = vpack.c.b16 %v8082_v8, %v8081_v7  ;;  %v8087_v24 = vld [vmem:[#allocation11_spill] sm:$0xff] }
 0x1ac   :  { %v1733_v2 = vrot.slane %v5148_v39, %v7027_v31  ;;  %v1740_v14 = vrot.slane %v5149_v49, %v7027_v31  ;;  %v1894_v21 = vrot.slane %v5160_v48, %v7027_v31  ;;  %v1901_v52 = vrot.slane %v5161_v20, %v7027_v31  ;;  %v8084_v20 = vld [vmem:[#allocation7_spill] sm:$0xff] }
 0x1ad   :  { %v2055_v15 = vrot.slane %v5172_v0, %v7027_v31  ;;  %v2062_v25 = vrot.slane %v5173_v11, %v7027_v31  ;;  %v2216_v42 = vrot.slane %v5184_v46, %v7027_v31  ;;  %v2223_v16 = vrot.slane %v5185_v44, %v7027_v31  ;;  %v8086_v11 = vld [vmem:[#allocation12_spill] sm:$0xff] }
 0x1ae   :  { %v1755_v28 = vcombine.low %v1733_v2, %v1740_v14  ;;  %v1916_v18 = vcombine.low %v1894_v21, %v1901_v52  ;;  %v1747_v30 = vrot.slane %v5150_v62, %v7027_v31  ;;  %v8083_v39 = vpack.c.b16 %v8075_v54, %v8074_v41  ;;  %v8089_v41 = vld [vmem:[#allocation32_spill] sm:$0xff] }
 0x1af   :  { %v2077_v48 = vcombine.low %v2055_v15, %v2062_v25  ;;  %v2238_v36 = vcombine.low %v2216_v42, %v2223_v16  ;;  %v8085_v0 = vpack.c.b16 %v8084_v20, %v8073_v9  ;;  %v8088_v46 = vpack.c.b16 %v8086_v11, %v8087_v24 }
 0x1b0   :  { %v1754_v49 = vrot.slane %v8083_v39, %v7027_v31  ;;  %v1763_v2 = vrot.slane %v1755_v28, %v7027_v31  ;;  %v1924_v62 = vrot.slane %v1916_v18, %v7027_v31  ;;  %v8090_v54 = vpack.c.b16 %v8078_v34, %v8089_v41  ;;  %v8097_v41 = vld [vmem:[#allocation17_spill] sm:$0xff] }
 0x1b1   :  { %v1908_v22 = vrot.slane %v8085_v0, %v7027_v31  ;;  %v1915_v44 = vrot.slane %v8088_v46, %v7027_v31  ;;  %v2085_v52 = vrot.slane %v2077_v48, %v7027_v31  ;;  %v2246_v9 = vrot.slane %v2238_v36, %v7027_v31  ;;  %v8093_v46 = vld [vmem:[#allocation14_spill] sm:$0xff] }
 0x1b2   :  { %v1756_v14 = vcombine.low %v1747_v30, %v1754_v49  ;;  %v2069_v21 = vrot.slane %v8090_v54, %v7027_v31  ;;  %v2076_v25 = vrot.slane %v5175_v27, %v7027_v31  ;;  %v5197_v42 = vcombine.low %v1763_v2, %v1924_v62 }
 0x1b3   :  { %v1917_v15 = vcombine.low %v1908_v22, %v1915_v44  ;;  %v8091_v28 = vpack.c.b16 %v6853_v17, %v6796_v63  ;;  %v2237_v30 = vrot.slane %v5187_v53, %v7027_v31  ;;  %v5199_v39 = vcombine.low %v2085_v52, %v2246_v9  ;;  %v8094_v63 = vld [vmem:[#allocation13_spill] sm:$0xff] }
 0x1b4   :  { %v1770_v16 = vrot.slane %v1756_v14, %v7027_v31  ;;  %v2078_v49 = vcombine.low %v2069_v21, %v2076_v25  ;;  %v1782_v48 = vrot.slane %v5152_v40, %v7027_v31  ;;  %v2784_v36 = vrot.slane %v5197_v42, %v7027_v31  ;;  %v8096_v40 = vld [vmem:[#allocation15_spill] sm:$0xff]  ;;  %v8100_v25 = vld [vmem:[#allocation22_spill] sm:$0xff] }
 0x1b5   :  { %v2230_v18 = vrot.slane %v8091_v28, %v7027_v31  ;;  %v1931_v34 = vrot.slane %v1917_v15, %v7027_v31  ;;  %v8092_v27 = vpack.c.b16 %v8087_v24, %v8084_v20  ;;  %v8095_v44 = vpack.c.b16 %v8093_v46, %v8094_v63 }
 0x1b6   :  { %v2798_v53 = vrot.slane %v5199_v39, %v7027_v31  ;;  %v2092_v62 = vrot.slane %v2078_v49, %v7027_v31  ;;  %v8098_v54 = vpack.c.b16 %v8096_v40, %v8097_v41  ;;  %v2104_v20 = vrot.slane %v5176_v3, %v7027_v31 }
 0x1b7   :  { %v2239_v0 = vcombine.low %v2230_v18, %v2237_v30  ;;  %v1789_v22 = vrot.slane %v8092_v27, %v7027_v31  ;;  %v1943_v2 = vrot.slane %v8095_v44, %v7027_v31  ;;  %v5198_v14 = vcombine.low %v1770_v16, %v1931_v34 }
 0x1b8   :  { %v1950_v21 = vrot.slane %v8098_v54, %v7027_v31  ;;  %v8099_v24 = vpack.c.b16 %v6843_v51, %v6853_v17  ;;  %v1715_v42 = vpack.c.b16 %v8100_v25, %v8100_v25  ;;  %v2807_v28 = vcombine.high %v2784_v36, %v2798_v53  ;;  %v5918_v17 = vld [vmem:[%s7954_s3 + $0x80] sm:$0xff]  }
 0x1b9   :  { %v2253_v52 = vrot.slane %v2239_v0, %v7027_v31  ;;  %v1804_v9 = vcombine.low %v1782_v48, %v1789_v22  ;;  %v2806_v16 = vcombine.low %v2784_v36, %v2798_v53  ;;  %v8101_v49 = vpack.c.b16 %v6846_v32, %v6837_v61  ;;  %v5921_v22 = vld [vmem:[%s7954_s3 + $0xc8] sm:$0xff]  }
 0x1ba   :  { %v2111_v15 = vrot.slane %v8099_v24, %v7027_v31  ;;  %v1965_v18 = vcombine.low %v1943_v2, %v1950_v21  ;;  %v2830_v48 = vrot.slane %v2807_v28, %v7027_v31  ;;  %v8102_v0 = vpack.c.b16 %v6885_v38, %v6867_v4 }
 0x1bb   :  { %v5200_v30 = vcombine.low %v2092_v62, %v2253_v52  ;;  %v1812_v39 = vrot.slane %v1804_v9, %v7027_v31  ;;  %v2265_v3 = vrot.slane %v8101_v49, %v7027_v31  ;;  %v7106_v51 = vrot.slane %v2806_v16, %v7027_v31  ;;  %v5925_v49 = vld [vmem:[%s7954_s3 + $0xd0] sm:$0xff]  }
 0x1bc   :  { %v2126_v34 = vcombine.low %v2104_v20, %v2111_v15  ;;  %v1973_v36 = vrot.slane %v1965_v18, %v7027_v31  ;;  %v2272_v27 = vrot.slane %v8102_v0, %v7027_v31  ;;  %v2791_v44 = vrot.slane %v5198_v14, %v7027_v31  ;;  %4259 = vmatprep.mubr.bf16.mxu1 %v2830_v48 }
 0x1bd   :  { %v2805_v2 = vrot.slane %v5200_v30, %v7027_v31  ;;  %v8103_v53 = vpack.c.b16 %v8094_v63, %v8086_v11  ;;  %v8104_v54 = vpack.c.b16 %v8097_v41, %v8093_v46  ;;  %v2840_v52 = vcombine.high %v2830_v48, %v2830_v48  ;;  %4260 = vmatmul.mubr.bf16.vlgmr.msra.gmra.mrb[0].mxu1 %v7106_v51  ;;  %v8105_v11 = vld [vmem:[#allocation18_spill] sm:$0xff]  ;;  %v8107_v30 = vld [vmem:[#allocation24_spill] sm:$0xff] }
 0x1be   :  { %v2134_v9 = vrot.slane %v2126_v34, %v7027_v31  ;;  %v2287_v20 = vcombine.low %v2265_v3, %v2272_v27  ;;  %v5201_v24 = vcombine.low %v1812_v39, %v1973_v36  ;;  %v8106_v63 = vpack.c.b16 %v8079_v13, %v8105_v11  ;;  %5478 = vmatpush3.bf16.msra.mxu1 %v5918_v17  ;;  %v5922_v46 = vld [vmem:[%s7954_s3 + $0x88] sm:$0xff]  }
 0x1bf   :  { %v1796_v62 = vrot.slane %v8103_v53, %v7027_v31  ;;  %v1803_v21 = vrot.slane %v8104_v54, %v7027_v31  ;;  %v2808_v14 = vcombine.low %v2791_v44, %v2805_v2  ;;  %v2809_v15 = vcombine.high %v2791_v44, %v2805_v2  ;;  %4299 = vmatprep.mubr.bf16.mxu1 %v2840_v52  ;;  %v8111_v53 = vld [vmem:[#allocation34_spill] sm:$0xff] }
 0x1c0   :  { %v1957_v16 = vrot.slane %v8106_v63, %v7027_v31  ;;  %v2295_v41 = vrot.slane %v2287_v20, %v7027_v31  ;;  %v7140_v18 = vrot.slane %v5201_v24, %v7027_v31  ;;  %v8108_v39 = vpack.c.b16 %v8107_v30, %v8080_v55  ;;  %5479 = vmatprep.subr.bf16.mxu1 %v5921_v22  ;;  %v5931_v20 = vld [vmem:[%s7954_s3 + $0x2c8] sm:$0xff]  }
 0x1c1   :  { %v1805_v28 = vcombine.low %v1796_v62, %v1803_v21  ;;  %v7150_v3 = vrot.slane %v2809_v15, %v7027_v31  ;;  %v7153_v48 = vrot.slane %v2808_v14, %v7027_v31  ;;  %v8109_v36 = vpack.c.b16 %v6837_v61, %v6827_v60  ;;  %v5928_v61 = vld [vmem:[%s7954_s3 + $0x280] sm:$0xff]   ;;  %v5929_v15 = vld [vmem:[%s7954_s3 + $0xd8] sm:$0xff]  }
 0x1c2   :  { %v1964_v34 = vrot.slane %v8108_v39, %v7027_v31  ;;  %v5203_v27 = vcombine.low %v2134_v9, %v2295_v41  ;;  %v8110_v22 = vpack.c.b16 %v6867_v4, %v6846_v32  ;;  %v8112_v62 = vpack.c.b16 %v6893_v1, %v8111_v53  ;;  %5480 = vmatpush3.bf16.msra.mxu1 %v5922_v46  ;;  %v5926_v9 = vld [vmem:[%s7954_s3 + $0x90] sm:$0xff]   ;;  %v8114_v63 = vld [vmem:[#allocation21_spill] sm:$0xff] }
 0x1c3   :  { %v1819_v17 = vrot.slane %v1805_v28, %v7027_v31  ;;  %v2118_v0 = vrot.slane %v8109_v36, %v7027_v31  ;;  %v2841_v21 = vcombine.high %v7150_v3, %v7150_v3  ;;  %v2839_v52 = vcombine.high %v7153_v48, %v7153_v48  ;;  %5481 = vmatprep.subr.bf16.mxu1 %v5925_v49 }
 0x1c4   :  { %v1966_v44 = vcombine.low %v1957_v16, %v1964_v34  ;;  %v2125_v2 = vrot.slane %v8110_v22, %v7027_v31  ;;  %v2279_v54 = vrot.slane %v8112_v62, %v7027_v31  ;;  %v2286_v60 = vrot.slane %v5191_v58, %v7027_v31  ;;  %v5930_v22 = vld [vmem:[%s7954_s3 + $0x98] sm:$0xff]  }
 0x1c5   :  { %v8113_v32 = vpack.c.b16 %v8105_v11, %v8096_v40  ;;  %v7190_v24 = vrot.slane %v5203_v27, %v7027_v31  ;;  %v1838_v40 = vrot.slane %v5157_v35, %v7027_v31  ;;  %4379 = vmatprep.mubr.bf16.mxu0 %v2841_v21  ;;  %v1992_v11 = vrot.slane %v5168_v50, %v7027_v31  ;;  %v5932_v50 = vld [vmem:[%s7954_s3 + $0x288] sm:$0xff]  }
 0x1c6   :  { %v1980_v14 = vrot.slane %v1966_v44, %v7027_v31  ;;  %v2127_v58 = vcombine.low %v2118_v0, %v2125_v2  ;;  %v2288_v28 = vcombine.low %v2279_v54, %v2286_v60  ;;  %v8115_v16 = vpack.c.b16 %v8100_v25, %v8114_v63  ;;  %4380 = vmatmul.mubr.bf16.vlgmr.msra.gmra.mrb[36].mxu0 %v2839_v52  ;;  %v8117_v27 = vld [vmem:[#allocation29_spill] sm:$0xff] }
 0x1c7   :  { %v1831_v4 = vrot.slane %v8113_v32, %v7027_v31  ;;  %v2875_v13 = vcombine.high %v7140_v18, %v7190_v24  ;;  %v2874_v55 = vcombine.low %v7140_v18, %v7190_v24  ;;  %5566 = vmatpush3.bf16.msra.mxu0 %v5928_v61  ;;  %v8116_v36 = vpack.c.b16 %v8111_v53, %v6885_v38  ;;  %v5933_v38 = vld [vmem:[%s7954_s3 + $0xe0] sm:$0xff]   ;;  %v5935_v53 = vld [vmem:[%s7954_s3 + $0x2d0] sm:$0xff]   ;;  %v5947_v25 = vld [vmem:[%s7954_s3 + $0x2e8] sm:$0xff]  }
 0x1c8   :  { %v1999_v46 = vrot.slane %v8115_v16, %v7027_v31  ;;  %v2141_v35 = vrot.slane %v2127_v58, %v7027_v31  ;;  %v5202_v41 = vcombine.low %v1819_v17, %v1980_v14  ;;  %v2302_v39 = vrot.slane %v2288_v28, %v7027_v31  ;;  %5482 = vmatpush3.bf16.msra.mxu1 %v5926_v9  ;;  %v8121_v16 = vld [vmem:[#allocation26_spill] sm:$0xff]  ;;  %v5960_v18 = vld [vmem:[%s7954_s3 + $0x380] sm:$0xff]  }
 0x1c9   :  { %v1853_v34 = vcombine.low %v1831_v4, %v1838_v40  ;;  %v2153_v0 = vrot.slane %v8116_v36, %v7027_v31  ;;  %v1716_v44 = vpack.c.b16 %v8117_v27, %v8117_v27  ;;  %v1721_v17 = vpack.c.b16 %v6929_v33, %v6929_v33  ;;  %5567 = vmatprep.subr.bf16.mxu0 %v5931_v20  ;;  %v5939_v40 = vld [vmem:[%s7954_s3 + $0x2d8] sm:$0xff]   ;;  %v5958_v24 = vld [vmem:[%s7954_s3 + $0x110] sm:$0xff]  }
 0x1ca   :  { %v2014_v49 = vcombine.low %v1992_v11, %v1999_v46  ;;  %v7229_v2 = vrot.slane %v2875_v13, %v7027_v31  ;;  %5483 = vmatprep.subr.bf16.mxu1 %v5929_v15  ;;  %v5204_v62 = vcombine.low %v2141_v35, %v2302_v39  ;;  %v8118_v52 = vpack.c.b16 %v6896_v5, %v6893_v1  ;;  %v5936_v1 = vld [vmem:[%s7954_s3 + $0x290] sm:$0xff]   ;;  %v5937_v13 = vld [vmem:[%s7954_s3 + $0xe8] sm:$0xff]   ;;  %v5945_v33 = vld [vmem:[%s7954_s3 + $0xf8] sm:$0xff]  }
 0x1cb   :  { %v1861_v54 = vrot.slane %v1853_v34, %v7027_v31  ;;  %v7246_v32 = vrot.slane %v5202_v41, %v7027_v31  ;;  %v2314_v4 = vrot.slane %v5192_v6, %v7027_v31  ;;  %v2321_v9 = vrot.slane %v5193_v37, %v7027_v31  ;;  %5568 = vmatpush3.bf16.msra.mxu0 %v5932_v50  ;;  %v5934_v37 = vld [vmem:[%s7954_s3 + $0xa0] sm:$0xff]   ;;  %v8124_v34 = vld [vmem:[#allocation27_spill] sm:$0xff] }
 0x1cc   :  { %v2022_v21 = vrot.slane %v2014_v49, %v7027_v31  ;;  %v2160_v61 = vrot.slane %v8118_v52, %v7027_v31  ;;  %v2908_v60 = vcombine.high %v7229_v2, %v7229_v2  ;;  %v7260_v5 = vrot.slane %v5204_v62, %v7027_v31  ;;  %5484 = vmatpush3.bf16.msra.mxu1 %v5930_v22  ;;  %v8125_v49 = vld [vmem:[#allocation28_spill] sm:$0xff] }
 0x1cd   :  { %v8119_v58 = vpack.c.b16 %v8081_v7, %v8107_v30  ;;  %v2336_v15 = vcombine.low %v2314_v4, %v2321_v9  ;;  %v8120_v28 = vpack.c.b16 %v8114_v63, %v8082_v8  ;;  %v8122_v7 = vld [vmem:[#allocation25_spill] sm:$0xff]  ;;  %5485 = vmatprep.subr.bf16.mxu1 %v5933_v38  ;;  %5569 = vmatprep.subr.bf16.mxu0 %v5935_v53  ;;  %v5940_v38 = vld [vmem:[%s7954_s3 + $0x298] sm:$0xff]  }
 0x1ce   :  { %v2175_v20 = vcombine.low %v2153_v0, %v2160_v61  ;;  %v5205_v14 = vcombine.low %v1861_v54, %v2022_v21  ;;  %4459 = vmatprep.mubr.bf16.mxu0 %v2908_v60  ;;  %v8123_v30 = vpack.c.b16 %v8121_v16, %v8122_v7  ;;  %v2877_v35 = vcombine.high %v7246_v32, %v7260_v5  ;;  %v5943_v61 = vld [vmem:[%s7954_s3 + $0x2e0] sm:$0xff]   ;;  %v5948_v16 = vld [vmem:[%s7954_s3 + $0x2a8] sm:$0xff]  }
 0x1cf   :  { %v1845_v6 = vrot.slane %v8119_v58, %v7027_v31  ;;  %v1852_v11 = vrot.slane %v8120_v28, %v7027_v31  ;;  %v2876_v41 = vcombine.low %v7246_v32, %v7260_v5  ;;  %v2344_v63 = vrot.slane %v2336_v15, %v7027_v31  ;;  %5570 = vmatpush3.bf16.msra.mxu0 %v5936_v1  ;;  %v5963_v32 = vld [vmem:[%s7954_s3 + $0x3c8] sm:$0xff]  }
 0x1d0   :  { %v2006_v46 = vrot.slane %v8123_v30, %v7027_v31  ;;  %v2183_v8 = vrot.slane %v2175_v20, %v7027_v31  ;;  %v2920_v50 = vrot.slane %v5205_v14, %v7027_v31  ;;  %v8126_v36 = vpack.c.b16 %v8124_v34, %v8125_v49  ;;  %5486 = vmatpush3.bf16.msra.mxu1 %v5934_v37  ;;  %v5952_v34 = vld [vmem:[%s7954_s3 + $0x2b0] sm:$0xff]  }
 0x1d1   :  { %v1854_v39 = vcombine.low %v1845_v6, %v1852_v11  ;;  %v1722_v22 = vpack.c.b16 %v6975_v10, %v6975_v10  ;;  %v7300_v53 = vrot.slane %v2876_v41, %v7027_v31  ;;  %v8127_v62 = vpack.c.b16 %v6918_v59, %v6870_v29  ;;  %v5938_v10 = vld [vmem:[%s7954_s3 + $0xa8] sm:$0xff]   ;;  %5571 = vmatprep.subr.bf16.mxu0 %v5939_v40  ;;  %v5941_v59 = vld [vmem:[%s7954_s3 + $0xf0] sm:$0xff]  }
 0x1d2   :  { %v2013_v0 = vrot.slane %v8126_v36, %v7027_v31  ;;  %v8128_v21 = vpack.c.b16 %v6926_v57, %v6921_v43  ;;  %v5207_v60 = vcombine.low %v2183_v8, %v2344_v63  ;;  %5487 = vmatprep.subr.bf16.mxu1 %v5937_v13  ;;  %v2328_v57 = vrot.slane %v5194_v47, %v7027_v31  ;;  %v5951_v13 = vld [vmem:[%s7954_s3 + $0x2f0] sm:$0xff]   ;;  %v5949_v8 = vld [vmem:[%s7954_s3 + $0x140] sm:$0xff]  }
 0x1d3   :  { %v2167_v54 = vrot.slane %v8127_v62, %v7027_v31  ;;  %v1868_v4 = vrot.slane %v1854_v39, %v7027_v31  ;;  %v2335_v20 = vrot.slane %v5195_v12, %v7027_v31  ;;  %v1876_v14 = vrot.slane %v1715_v42, %v7027_v31  ;;  %5572 = vmatpush3.bf16.msra.mxu0 %v5940_v38  ;;  %v5942_v12 = vld [vmem:[%s7954_s3 + $0xb0] sm:$0xff]   ;;  %v5950_v36 = vld [vmem:[%s7954_s3 + $0x100] sm:$0xff]   ;;  %v5953_v62 = vld [vmem:[%s7954_s3 + $0x148] sm:$0xff]  }
 0x1d4   :  { %v2174_v52 = vrot.slane %v8128_v21, %v7027_v31  ;;  %v2015_v29 = vcombine.low %v2006_v46, %v2013_v0  ;;  %v2934_v9 = vrot.slane %v5207_v60, %v7027_v31  ;;  %v2037_v47 = vrot.slane %v1716_v44, %v7027_v31  ;;  %5488 = vmatpush3.bf16.msra.mxu1 %v5938_v10  ;;  %v5946_v46 = vld [vmem:[%s7954_s3 + $0xb8] sm:$0xff]   ;;  %v5954_v60 = vld [vmem:[%s7954_s3 + $0x108] sm:$0xff]  }
 0x1d5   :  { %v2198_v19 = vrot.slane %v1721_v17, %v7027_v31  ;;  %v2359_v56 = vrot.slane %v1722_v22, %v7027_v31  ;;  %5573 = vmatprep.subr.bf16.mxu0 %v5943_v61  ;;  %v2337_v44 = vcombine.low %v2328_v57, %v2335_v20  ;;  %5489 = vmatprep.subr.bf16.mxu1 %v5941_v59  ;;  %v5962_v57 = vld [vmem:[%s7954_s3 + $0x118] sm:$0xff]   ;;  %v5968_v20 = vld [vmem:[%s7954_s3 + $0x390] sm:$0xff]  }
 0x1d6   :  { %v2176_v43 = vcombine.low %v2167_v54, %v2174_v52  ;;  %v2029_v1 = vrot.slane %v2015_v29, %v7027_v31  ;;  %v2943_v42 = vcombine.high %v2920_v50, %v2934_v9  ;;  %v2942_v27 = vcombine.low %v2920_v50, %v2934_v9  ;;  %v5955_v54 = vld [vmem:[%s7954_s3 + $0x2f8] sm:$0xff]   ;;  %v5959_v29 = vld [vmem:[%s7954_s3 + $0x3c0] sm:$0xff]   ;;  %v5967_v9 = vld [vmem:[%s7954_s3 + $0x3d0] sm:$0xff]  }
 0x1d7   :  { %v1883_v58 = vrot.slane %v1876_v14, %v7027_v31  ;;  %v2044_v6 = vrot.slane %v2037_v47, %v7027_v31  ;;  %v2205_v37 = vrot.slane %v2198_v19, %v7027_v31  ;;  %v2351_v28 = vrot.slane %v2337_v44, %v7027_v31  ;;  %5574 = vmatpush3.bf16.msra.mxu0 %v5944_v26  ;;  %v5966_v14 = vld [vmem:[%s7954_s3 + $0x120] sm:$0xff]   ;;  %v5971_v26 = vld [vmem:[%s7954_s3 + $0x3d8] sm:$0xff]   ;;  %v5970_v19 = vld [vmem:[%s7954_s3 + $0x128] sm:$0xff]  }
 0x1d8   :  { %v2190_v23 = vrot.slane %v2176_v43, %v7027_v31  ;;  %v5206_v17 = vcombine.low %v1868_v4, %v2029_v1  ;;  %v7360_v40 = vrot.slane %v2943_v42, %v7027_v31  ;;  %v7363_v15 = vrot.slane %v2942_v27, %v7027_v31  ;;  %5490 = vmatpush3.bf16.msra.mxu1 %v5942_v12  ;;  %v5964_v43 = vld [vmem:[%s7954_s3 + $0x388] sm:$0xff]   ;;  %v5965_v1 = vld [vmem:[%s7954_s3 + $0x160] sm:$0xff]   ;;  %v5972_v47 = vld [vmem:[%s7954_s3 + $0x398] sm:$0xff]  }
 0x1d9   :  { %v2366_v11 = vrot.slane %v2359_v56, %v7027_v31  ;;  %v2978_v30 = vcombine.low %v1883_v58, %v2044_v6  ;;  %5575 = vmatprep.subr.bf16.mxu0 %v5947_v25  ;;  %5491 = vmatprep.subr.bf16.mxu1 %v5945_v33  ;;  %v2838_v38 = vcombine.high %v7106_v51, %v7106_v51  ;;  %v5956_v51 = vld [vmem:[%s7954_s3 + $0x2b8] sm:$0xff]   ;;  %v5975_v56 = vld [vmem:[%s7954_s3 + $0x3e0] sm:$0xff]   ;;  %v5973_v12 = vld [vmem:[%s7954_s3 + $0x170] sm:$0xff]  }
 0x1da   :  { %v2927_v7 = vrot.slane %v5206_v17, %v7027_v31  ;;  %v5208_v41 = vcombine.low %v2190_v23, %v2351_v28  ;;  %v7418_v4 = vrot.slane %v2874_v55, %v7027_v31  ;;  %v7430_v59 = vrot.slane %v2877_v35, %v7027_v31  ;;  %v5961_v35 = vld [vmem:[%s7954_s3 + $0x158] sm:$0xff]   ;;  %v5969_v23 = vld [vmem:[%s7954_s3 + $0x168] sm:$0xff]   ;;  %v5976_v25 = vld [vmem:[%s7954_s3 + $0x3a0] sm:$0xff]  }
 0x1db   :  { %v2979_v63 = vcombine.low %v2205_v37, %v2366_v11  ;;  %v2986_v50 = vrot.slane %v2978_v30, %v7027_v31  ;;  %5576 = vmatpush3.bf16.msra.mxu0 %v5948_v16  ;;  %v5974_v42 = vld [vmem:[%s7954_s3 + $0x130] sm:$0xff]   ;;  %v5979_v27 = vld [vmem:[%s7954_s3 + $0x3e8] sm:$0xff]   ;;  %v5977_v44 = vld [vmem:[%s7954_s3 + $0x178] sm:$0xff]  }
 0x1dc   :  { %v2941_v39 = vrot.slane %v5208_v41, %v7027_v31  ;;  %5492 = vmatpush3.bf16.msra.mxu1 %v5946_v46  ;;  %5577 = vmatprep.subr.bf16.mxu0 %v5951_v13  ;;  %v2906_v55 = vcombine.high %v7418_v4, %v7418_v4  ;;  %v2909_v5 = vcombine.high %v7430_v59, %v7430_v59  ;;  %v5980_v33 = vld [vmem:[%s7954_s3 + $0x3a8] sm:$0xff]   ;;  %v5978_v17 = vld [vmem:[%s7954_s3 + $0x138] sm:$0xff]   ;;  %v5983_v58 = vld [vmem:[%s7954_s3 + $0x3f0] sm:$0xff]  }
 0x1dd   :  { %v2993_v49 = vrot.slane %v2979_v63, %v7027_v31  ;;  %5499 = vmatprep.subr.bf16.mxu1 %v5949_v8  ;;  %v5981_v6 = vld [vmem:[%s7954_s3 + $0x240] sm:$0xff]   ;;  %v5984_v37 = vld [vmem:[%s7954_s3 + $0x3b0] sm:$0xff]   ;;  %v5985_v11 = vld [vmem:[%s7954_s3 + $0x248] sm:$0xff]   ;;  %v2907_v41 = vcombine.high %v7300_v53, %v7300_v53  ;;  %v2976_v63 = vcombine.high %v7360_v40, %v7360_v40 }
 0x1de   :  { %v2945_v0 = vcombine.high %v2927_v7, %v2941_v39  ;;  %v2944_v22 = vcombine.low %v2927_v7, %v2941_v39  ;;  %v5982_v28 = vld [vmem:[%s7954_s3 + $0x200] sm:$0xff]   ;;  %v5987_v16 = vld [vmem:[%s7954_s3 + $0x3f8] sm:$0xff]   ;;  %v5986_v30 = vld [vmem:[%s7954_s3 + $0x208] sm:$0xff]  }
 0x1df   :  { %v7397_v21 = vcombine.low %v2986_v50, %v2993_v49  ;;  %4300 = vmatmul.mubr.bf16.vlgmr.msra.gmra.mrb[4].mxu1 %v2838_v38  ;;  %5578 = vmatpush3.bf16.msra.mxu0 %v5952_v34  ;;  %v5988_v7 = vld [vmem:[%s7954_s3 + $0x3b8] sm:$0xff]   ;;  %v5991_v46 = vld [vmem:[%s7954_s3 + $0x4c0] sm:$0xff]   ;;  %v5995_v8 = vld [vmem:[%s7954_s3 + $0x4c8] sm:$0xff]  }
 0x1e0   :  { %v7400_v52 = vrot.slane %v2945_v0, %v7027_v31  ;;  %v7403_v10 = vrot.slane %v2944_v22, %v7027_v31  ;;  %5500 = vmatpush3.bf16.msra.mxu1 %v5950_v36  ;;  %4339 = vmatprep.mubr.bf16.mxu1 %v7150_v3  ;;  %v5957_v3 = vld [vmem:[%s7954_s3 + $0x150] sm:$0xff]   ;;  %v5992_v13 = vld [vmem:[%s7954_s3 + $0x480] sm:$0xff]   ;;  %v5993_v50 = vld [vmem:[%s7954_s3 + $0x258] sm:$0xff]  }
 0x1e1   :  { %v3001_v61 = vrot.slane %v7397_v21, %v7027_v31  ;;  %5501 = vmatprep.subr.bf16.mxu1 %v5953_v62  ;;  %5579 = vmatprep.subr.bf16.mxu0 %v5955_v54  ;;  %v5996_v39 = vld [vmem:[%s7954_s3 + $0x488] sm:$0xff]   ;;  %v5994_v34 = vld [vmem:[%s7954_s3 + $0x218] sm:$0xff]   ;;  %v5999_v49 = vld [vmem:[%s7954_s3 + $0x4d0] sm:$0xff]  }
 0x1e2   :  { %v5997_v36 = vld [vmem:[%s7954_s3 + $0x260] sm:$0xff]   ;;  %v6000_v0 = vld [vmem:[%s7954_s3 + $0x490] sm:$0xff]   ;;  %v6003_v38 = vld [vmem:[%s7954_s3 + $0x4d8] sm:$0xff]  }
 0x1e3   :  { %5580 = vmatpush3.bf16.msra.mxu0 %v5956_v51  ;;  %v5998_v22 = vld [vmem:[%s7954_s3 + $0x220] sm:$0xff]   ;;  %v6001_v62 = vld [vmem:[%s7954_s3 + $0x268] sm:$0xff]   ;;  %v6004_v54 = vld [vmem:[%s7954_s3 + $0x498] sm:$0xff]  }
 0x1e4   :  { %5502 = vmatpush3.bf16.msra.mxu1 %v5954_v60  ;;  %5609 = vmatprep.subr.bf16.mxu0 %v5959_v29  ;;  %v6002_v51 = vld [vmem:[%s7954_s3 + $0x228] sm:$0xff]   ;;  %v6007_v60 = vld [vmem:[%s7954_s3 + $0x4e0] sm:$0xff]   ;;  %v6005_v29 = vld [vmem:[%s7954_s3 + $0x270] sm:$0xff]  }
 0x1e5   :  { %5503 = vmatprep.subr.bf16.mxu1 %v5957_v3  ;;  %v6008_v3 = vld [vmem:[%s7954_s3 + $0x4a0] sm:$0xff]  }
 0x1e6   :  { %4460 = vmatmul.mubr.bf16.vlgmr.msra.gmra.mrb[40].mxu0 %v2906_v55  ;;  %v6009_v55 = vld [vmem:[%s7954_s3 + $0x278] sm:$0xff]  }
 0x1e7   :  { %5610 = vmatpush3.bf16.msra.mxu0 %v5960_v18  ;;  %4539 = vmatprep.mubr.bf16.mxu0 %v2909_v5  ;;  %v6006_v18 = vld [vmem:[%s7954_s3 + $0x230] sm:$0xff]   ;;  %v6010_v5 = vld [vmem:[%s7954_s3 + $0x238] sm:$0xff]  }
 0x1e8   :  { %5504 = vmatpush3.bf16.msra.mxu1 %v5958_v24  ;;  %5611 = vmatprep.subr.bf16.mxu0 %v5963_v32  ;;  %v6011_v24 = vld [vmem:[%s7954_s3 + $0x4e8] sm:$0xff]  }
 0x1e9   :  { %5505 = vmatprep.subr.bf16.mxu1 %v5961_v35  ;;  %v6012_v32 = vld [vmem:[%s7954_s3 + $0x4a8] sm:$0xff]   ;;  %v6015_v35 = vld [vmem:[%s7954_s3 + $0x4f0] sm:$0xff]  }
 0x1eb   :  { %5612 = vmatpush3.bf16.msra.mxu0 %v5964_v43  ;;  %v6013_v43 = vld [vmem:[%s7954_s3 + $0x340] sm:$0xff]  }
 0x1ec   :  { %5506 = vmatpush3.bf16.msra.mxu1 %v5962_v57  ;;  %5613 = vmatprep.subr.bf16.mxu0 %v5967_v9  ;;  %v6016_v57 = vld [vmem:[%s7954_s3 + $0x4b0] sm:$0xff]   ;;  %v6014_v9 = vld [vmem:[%s7954_s3 + $0x300] sm:$0xff]  }
 0x1ed   :  { %5507 = vmatprep.subr.bf16.mxu1 %v5965_v1  ;;  %v6017_v1 = vld [vmem:[%s7954_s3 + $0x348] sm:$0xff]  }
 0x1ef   :  { %5614 = vmatpush3.bf16.msra.mxu0 %v5968_v20  ;;  %v6019_v20 = vld [vmem:[%s7954_s3 + $0x4f8] sm:$0xff]  }
 0x1f0   :  { %5508 = vmatpush3.bf16.msra.mxu1 %v5966_v14  ;;  %5615 = vmatprep.subr.bf16.mxu0 %v5971_v26  ;;  %v6020_v14 = vld [vmem:[%s7954_s3 + $0x4b8] sm:$0xff]   ;;  %v6018_v26 = vld [vmem:[%s7954_s3 + $0x308] sm:$0xff]  }
 0x1f1   :  { %5509 = vmatprep.subr.bf16.mxu1 %v5969_v23  ;;  %v6023_v23 = vld [vmem:[%s7954_s3 + $0x5c0] sm:$0xff]  }
 0x1f3   :  { %5616 = vmatpush3.bf16.msra.mxu0 %v5972_v47  ;;  %v6024_v47 = vld [vmem:[%s7954_s3 + $0x580] sm:$0xff]  }
 0x1f4   :  { %5510 = vmatpush3.bf16.msra.mxu1 %v5970_v19  ;;  %5617 = vmatprep.subr.bf16.mxu0 %v5975_v56  ;;  %v2974_v19 = vcombine.high %v7363_v15, %v7363_v15  ;;  %v6027_v56 = vld [vmem:[%s7954_s3 + $0x5c8] sm:$0xff]  }
 0x1f5   :  { %5511 = vmatprep.subr.bf16.mxu1 %v5973_v12  ;;  %v2977_v12 = vcombine.high %v7400_v52, %v7400_v52 }
 0x1f7   :  { %5618 = vmatpush3.bf16.msra.mxu0 %v5976_v25  ;;  %v6025_v25 = vld [vmem:[%s7954_s3 + $0x358] sm:$0xff]  }
 0x1f8   :  { %5512 = vmatpush3.bf16.msra.mxu1 %v5974_v42  ;;  %5619 = vmatprep.subr.bf16.mxu0 %v5979_v27  ;;  %v6028_v42 = vld [vmem:[%s7954_s3 + $0x588] sm:$0xff]   ;;  %v6026_v27 = vld [vmem:[%s7954_s3 + $0x318] sm:$0xff]  }
 0x1f9   :  { %5513 = vmatprep.subr.bf16.mxu1 %v5977_v44  ;;  %v6031_v44 = vld [vmem:[%s7954_s3 + $0x5d0] sm:$0xff]  }
 0x1fb   :  { %5620 = vmatpush3.bf16.msra.mxu0 %v5980_v33  ;;  %v6029_v33 = vld [vmem:[%s7954_s3 + $0x360] sm:$0xff]  }
 0x1fc   :  { %5514 = vmatpush3.bf16.msra.mxu1 %v5978_v17  ;;  %5621 = vmatprep.subr.bf16.mxu0 %v5983_v58  ;;  %v6032_v17 = vld [vmem:[%s7954_s3 + $0x590] sm:$0xff]   ;;  %v6030_v58 = vld [vmem:[%s7954_s3 + $0x320] sm:$0xff]  }
 0x1fd   :  { %5543 = vmatprep.subr.bf16.mxu1 %v5981_v6  ;;  %v6035_v6 = vld [vmem:[%s7954_s3 + $0x5d8] sm:$0xff]  }
 0x1ff   :  { %4340 = vmatmul.mubr.bf16.vlgmr.msra.gmra.mrb[8].mxu1 %v7153_v48  ;;  %5622 = vmatpush3.bf16.msra.mxu0 %v5984_v37  ;;  %v5989_v48 = vld [vmem:[%s7954_s3 + $0x250] sm:$0xff]   ;;  %v6033_v37 = vld [vmem:[%s7954_s3 + $0x368] sm:$0xff]  }
 0x200   :  { %5544 = vmatpush3.bf16.msra.mxu1 %v5982_v28  ;;  %4419 = vmatprep.mubr.bf16.mxu1 %v7229_v2  ;;  %v5990_v2 = vld [vmem:[%s7954_s3 + $0x210] sm:$0xff]   ;;  %v6036_v28 = vld [vmem:[%s7954_s3 + $0x598] sm:$0xff]  }
 0x201   :  { %5545 = vmatprep.subr.bf16.mxu1 %v5985_v11  ;;  %5623 = vmatprep.subr.bf16.mxu0 %v5987_v16  ;;  %v6034_v11 = vld [vmem:[%s7954_s3 + $0x328] sm:$0xff]   ;;  %v6039_v16 = vld [vmem:[%s7954_s3 + $0x5e0] sm:$0xff]  }
 0x203   :  { %5624 = vmatpush3.bf16.msra.mxu0 %v5988_v7  ;;  %v6037_v7 = vld [vmem:[%s7954_s3 + $0x370] sm:$0xff]  }
 0x204   :  { %5546 = vmatpush3.bf16.msra.mxu1 %v5986_v30  ;;  %5653 = vmatprep.subr.bf16.mxu0 %v5991_v46  ;;  %v6040_v30 = vld [vmem:[%s7954_s3 + $0x5a0] sm:$0xff]   ;;  %v6038_v46 = vld [vmem:[%s7954_s3 + $0x330] sm:$0xff]  }
 0x205   :  { %5547 = vmatprep.subr.bf16.mxu1 %v5989_v48  ;;  %v6043_v48 = vld [vmem:[%s7954_s3 + $0x5e8] sm:$0xff]  }
 0x206   :  { %4540 = vmatmul.mubr.bf16.vlgmr.msra.gmra.mrb[44].mxu0 %v2907_v41  ;;  %v6042_v41 = vld [vmem:[%s7954_s3 + $0x338] sm:$0xff]  }
 0x207   :  { %5654 = vmatpush3.bf16.msra.mxu0 %v5992_v13  ;;  %4619 = vmatprep.mubr.bf16.mxu0 %v2976_v63  ;;  %v6041_v13 = vld [vmem:[%s7954_s3 + $0x378] sm:$0xff]   ;;  %v6045_v63 = vld [vmem:[%s7954_s3 + $0x440] sm:$0xff]  }
 0x208   :  { %5548 = vmatpush3.bf16.msra.mxu1 %v5990_v2  ;;  %5655 = vmatprep.subr.bf16.mxu0 %v5995_v8  ;;  %v6044_v2 = vld [vmem:[%s7954_s3 + $0x5a8] sm:$0xff]   ;;  %v6047_v8 = vld [vmem:[%s7954_s3 + $0x5f0] sm:$0xff]  }
 0x209   :  { %5549 = vmatprep.subr.bf16.mxu1 %v5993_v50  ;;  %v6048_v50 = vld [vmem:[%s7954_s3 + $0x5b0] sm:$0xff]  }
 0x20b   :  { %5656 = vmatpush3.bf16.msra.mxu0 %v5996_v39  ;;  %v6046_v39 = vld [vmem:[%s7954_s3 + $0x400] sm:$0xff]  }
 0x20c   :  { %5550 = vmatpush3.bf16.msra.mxu1 %v5994_v34  ;;  %5657 = vmatprep.subr.bf16.mxu0 %v5999_v49  ;;  %v6049_v34 = vld [vmem:[%s7954_s3 + $0x448] sm:$0xff]   ;;  %v6051_v49 = vld [vmem:[%s7954_s3 + $0x5f8] sm:$0xff]  }
 0x20d   :  { %5551 = vmatprep.subr.bf16.mxu1 %v5997_v36  ;;  %v6052_v36 = vld [vmem:[%s7954_s3 + $0x5b8] sm:$0xff]  }
 0x20f   :  { %5658 = vmatpush3.bf16.msra.mxu0 %v6000_v0  ;;  %v6050_v0 = vld [vmem:[%s7954_s3 + $0x408] sm:$0xff]  }
 0x210   :  { %5552 = vmatpush3.bf16.msra.mxu1 %v5998_v22  ;;  %5659 = vmatprep.subr.bf16.mxu0 %v6003_v38  ;;  %v6053_v22 = vld [vmem:[%s7954_s3 + $0x450] sm:$0xff]   ;;  %v2975_v38 = vcombine.high %v7403_v10, %v7403_v10 }
 0x211   :  { %5553 = vmatprep.subr.bf16.mxu1 %v6001_v62  ;;  %v6055_v62 = vld [vmem:[%s7954_s3 + $0x458] sm:$0xff]  }
 0x213   :  { %5660 = vmatpush3.bf16.msra.mxu0 %v6004_v54  ;;  %v6056_v54 = vld [vmem:[%s7954_s3 + $0x418] sm:$0xff]  }
 0x214   :  { %5554 = vmatpush3.bf16.msra.mxu1 %v6002_v51  ;;  %5661 = vmatprep.subr.bf16.mxu0 %v6007_v60  ;;  %v6057_v51 = vld [vmem:[%s7954_s3 + $0x460] sm:$0xff]  }
 0x215   :  { %5555 = vmatprep.subr.bf16.mxu1 %v6005_v29  ;;  %v6058_v60 = vld [vmem:[%s7954_s3 + $0x420] sm:$0xff]   ;;  %v6059_v29 = vld [vmem:[%s7954_s3 + $0x468] sm:$0xff]  }
 0x217   :  { %5662 = vmatpush3.bf16.msra.mxu0 %v6008_v3  ;;  %v6060_v3 = vld [vmem:[%s7954_s3 + $0x428] sm:$0xff]  }
 0x218   :  { %5556 = vmatpush3.bf16.msra.mxu1 %v6006_v18  ;;  %5663 = vmatprep.subr.bf16.mxu0 %v6011_v24  ;;  %v6061_v18 = vld [vmem:[%s7954_s3 + $0x470] sm:$0xff]  }
 0x219   :  { %5557 = vmatprep.subr.bf16.mxu1 %v6009_v55  ;;  %v6062_v24 = vld [vmem:[%s7954_s3 + $0x430] sm:$0xff]   ;;  %v6063_v55 = vld [vmem:[%s7954_s3 + $0x478] sm:$0xff]  }
 0x21b   :  { %5664 = vmatpush3.bf16.msra.mxu0 %v6012_v32  ;;  %v6064_v32 = vld [vmem:[%s7954_s3 + $0x438] sm:$0xff]  }
 0x21c   :  { %5558 = vmatpush3.bf16.msra.mxu1 %v6010_v5  ;;  %5665 = vmatprep.subr.bf16.mxu0 %v6015_v35  ;;  %v6065_v5 = vld [vmem:[%s7954_s3 + $0x540] sm:$0xff]  }
 0x21d   :  { %5587 = vmatprep.subr.bf16.mxu1 %v6013_v43  ;;  %v6066_v35 = vld [vmem:[%s7954_s3 + $0x500] sm:$0xff]   ;;  %v6067_v43 = vld [vmem:[%s7954_s3 + $0x548] sm:$0xff]  }
 0x21f   :  { %4420 = vmatmul.mubr.bf16.vlgmr.msra.gmra.mrb[12].mxu1 %v7418_v4  ;;  %5666 = vmatpush3.bf16.msra.mxu0 %v6016_v57  ;;  %v6021_v4 = vld [vmem:[%s7954_s3 + $0x350] sm:$0xff]   ;;  %v6068_v57 = vld [vmem:[%s7954_s3 + $0x508] sm:$0xff]  }
 0x220   :  { %5588 = vmatpush3.bf16.msra.mxu1 %v6014_v9  ;;  %4499 = vmatprep.mubr.bf16.mxu1 %v7430_v59  ;;  %v6022_v59 = vld [vmem:[%s7954_s3 + $0x310] sm:$0xff]  }
 0x221   :  { %5589 = vmatprep.subr.bf16.mxu1 %v6017_v1  ;;  %5667 = vmatprep.subr.bf16.mxu0 %v6019_v20  ;;  %v6069_v9 = vld [vmem:[%s7954_s3 + $0x550] sm:$0xff]   ;;  %v6073_v20 = vld [vmem:[%s7954_s3 + $0x560] sm:$0xff]  }
 0x222   :  { %v6070_v1 = vld [vmem:[%s7954_s3 + $0x510] sm:$0xff]  }
 0x223   :  { %5668 = vmatpush3.bf16.msra.mxu0 %v6020_v14  ;;  %v6074_v14 = vld [vmem:[%s7954_s3 + $0x520] sm:$0xff]  }
 0x224   :  { %5590 = vmatpush3.bf16.msra.mxu1 %v6018_v26  ;;  %5697 = vmatprep.subr.bf16.mxu0 %v6023_v23  ;;  %v6075_v26 = vld [vmem:[%s7954_s3 + $0x568] sm:$0xff]  }
 0x225   :  { %5591 = vmatprep.subr.bf16.mxu1 %v6021_v4  ;;  %v6076_v23 = vld [vmem:[%s7954_s3 + $0x528] sm:$0xff]   ;;  %v6077_v4 = vld [vmem:[%s7954_s3 + $0x570] sm:$0xff]  }
 0x226   :  { %4620 = vmatmul.mubr.bf16.vlgmr.msra.gmra.mrb[48].mxu0 %v2974_v19  ;;  %v6080_v19 = vld [vmem:[%s7954_s3 + $0x538] sm:$0xff]  }
 0x227   :  { %5698 = vmatpush3.bf16.msra.mxu0 %v6024_v47  ;;  %4699 = vmatprep.mubr.bf16.mxu0 %v2977_v12  ;;  %v6078_v47 = vld [vmem:[%s7954_s3 + $0x530] sm:$0xff]   ;;  %v6082_v12 = vld [vmem:[%s7954_s3 + $0x608] sm:$0xff]  }
 0x228   :  { %5592 = vmatpush3.bf16.msra.mxu1 %v6022_v59  ;;  %5699 = vmatprep.subr.bf16.mxu0 %v6027_v56  ;;  %v6079_v59 = vld [vmem:[%s7954_s3 + $0x578] sm:$0xff]   ;;  %v6081_v56 = vld [vmem:[%s7954_s3 + $0x600] sm:$0xff]  }
 0x229   :  { %5593 = vmatprep.subr.bf16.mxu1 %v6025_v25  ;;  %v6083_v25 = vld [vmem:[%s7954_s3 + $0x610] sm:$0xff]  }
 0x22b   :  { %5700 = vmatpush3.bf16.msra.mxu0 %v6028_v42  ;;  %v6085_v42 = vld [vmem:[%s7954_s3 + $0x620] sm:$0xff]  }
 0x22c   :  { %5594 = vmatpush3.bf16.msra.mxu1 %v6026_v27  ;;  %5701 = vmatprep.subr.bf16.mxu0 %v6031_v44  ;;  %v6086_v27 = vld [vmem:[%s7954_s3 + $0x628] sm:$0xff]  }
 0x22d   :  { %5595 = vmatprep.subr.bf16.mxu1 %v6029_v33 }
 0x22f   :  { %5702 = vmatpush3.bf16.msra.mxu0 %v6032_v17 }
 0x230   :  { %5596 = vmatpush3.bf16.msra.mxu1 %v6030_v58  ;;  %5703 = vmatprep.subr.bf16.mxu0 %v6035_v6  ;;  %v6087_v6 = vld [vmem:[%s7954_s3 + $0x630] sm:$0xff]  }
 0x231   :  { %5597 = vmatprep.subr.bf16.mxu1 %v6033_v37 }
 0x233   :  { %5704 = vmatpush3.bf16.msra.mxu0 %v6036_v28  ;;  %v6088_v28 = vld [vmem:[%s7954_s3 + $0x638] sm:$0xff]  }
 0x234   :  { %5598 = vmatpush3.bf16.msra.mxu1 %v6034_v11  ;;  %5705 = vmatprep.subr.bf16.mxu0 %v6039_v16 }
 0x235   :  { %5599 = vmatprep.subr.bf16.mxu1 %v6037_v7 }
 0x237   :  { %5706 = vmatpush3.bf16.msra.mxu0 %v6040_v30 }
 0x238   :  { %5600 = vmatpush3.bf16.msra.mxu1 %v6038_v46  ;;  %5707 = vmatprep.subr.bf16.mxu0 %v6043_v48  ;;  %v5196_v48 = vld [vmem:[%s7955_s4] ss:$0 sm:$0xff] }
 0x239   :  { %5601 = vmatprep.subr.bf16.mxu1 %v6041_v13 }
 0x23b   :  { %5708 = vmatpush3.bf16.msra.mxu0 %v6044_v2 }
 0x23c   :  { %5602 = vmatpush3.bf16.msra.mxu1 %v6042_v41  ;;  %5709 = vmatprep.subr.bf16.mxu0 %v6047_v8 }
 0x23d   :  { %5631 = vmatprep.subr.bf16.mxu1 %v6045_v63 }
 0x23f   :  { %4500 = vmatmul.mubr.bf16.vlgmr.msra.gmra.mrb[16].mxu1 %v7300_v53  ;;  %5710 = vmatpush3.bf16.msra.mxu0 %v6048_v50  ;;  %v6054_v53 = vld [vmem:[%s7954_s3 + $0x410] sm:$0xff]  }
 0x240   :  { %5632 = vmatpush3.bf16.msra.mxu1 %v6046_v39  ;;  %4579 = vmatprep.mubr.bf16.mxu1 %v7360_v40  ;;  %v6136_v40 = vmov 0.0  }
 0x241   :  { %5633 = vmatprep.subr.bf16.mxu1 %v6049_v34  ;;  %5711 = vmatprep.subr.bf16.mxu0 %v6051_v49 }
 0x243   :  { %5712 = vmatpush3.bf16.msra.mxu0 %v6052_v36 }
 0x244   :  { %5634 = vmatpush3.bf16.msra.mxu1 %v6050_v0  ;;  %5818 = vmatprep.subr.bf16.mxu0 %v6136_v40 }
 0x245   :  { %5635 = vmatprep.subr.bf16.mxu1 %v6053_v22 }
 0x246   :  { %4700 = vmatmul.mubr.bf16.vlgmr.msra.gmra.mrb[52].mxu0 %v2975_v38 }
 0x247   :  { %5834 = vmatprep.mubr.msk.bf16.mxu0 %vm6137_vm1, %v6136_v40 }
 0x248   :  { %5636 = vmatpush3.bf16.msra.mxu1 %v6054_v53 }
 0x249   :  { %5637 = vmatprep.subr.bf16.mxu1 %v6055_v62 }
 0x24c   :  { %5638 = vmatpush3.bf16.msra.mxu1 %v6056_v54  ;;  %v6089_v54 = vld [vmem:[%s7956_s5] sm:$0xff]  }
 0x24d   :  { %5639 = vmatprep.subr.bf16.mxu1 %v6057_v51  ;;  %5819 = vmatpush3.bf16.msra.mxu0 %v6089_v54 }
 0x24e   :  { %5820 = vmatprep.subr.bf16.mxu0 %v6136_v40 }
 0x250   :  { %5640 = vmatpush3.bf16.msra.mxu1 %v6058_v60  ;;  %v6090_v60 = vld [vmem:[%s7956_s5 + $0x8] sm:$0xff]  }
 0x251   :  { %5641 = vmatprep.subr.bf16.mxu1 %v6059_v29  ;;  %5821 = vmatpush3.bf16.msra.mxu0 %v6090_v60 }
 0x252   :  { %5822 = vmatprep.subr.bf16.mxu0 %v6136_v40 }
 0x254   :  { %5642 = vmatpush3.bf16.msra.mxu1 %v6060_v3 }
 0x255   :  { %5643 = vmatprep.subr.bf16.mxu1 %v6061_v18 }
 0x258   :  { %5644 = vmatpush3.bf16.msra.mxu1 %v6062_v24 }
 0x259   :  { %5645 = vmatprep.subr.bf16.mxu1 %v6063_v55 }
 0x25c   :  { %5646 = vmatpush3.bf16.msra.mxu1 %v6064_v32 }
 0x25d   :  { %5675 = vmatprep.subr.bf16.mxu1 %v6065_v5 }
 0x25f   :  { %4580 = vmatmul.mubr.bf16.vlgmr.msra.gmra.mrb[20].mxu1 %v7363_v15  ;;  %v6071_v15 = vld [vmem:[%s7954_s3 + $0x558] sm:$0xff]  }
 0x260   :  { %5676 = vmatpush3.bf16.msra.mxu1 %v6066_v35  ;;  %4659 = vmatprep.mubr.bf16.mxu1 %v7400_v52  ;;  %v6072_v52 = vld [vmem:[%s7954_s3 + $0x518] sm:$0xff]  }
 0x261   :  { %5677 = vmatprep.subr.bf16.mxu1 %v6067_v43 }
 0x264   :  { %5678 = vmatpush3.bf16.msra.mxu1 %v6068_v57 }
 0x265   :  { %5679 = vmatprep.subr.bf16.mxu1 %v6069_v9 }
 0x268   :  { %5680 = vmatpush3.bf16.msra.mxu1 %v6070_v1 }
 0x269   :  { %5681 = vmatprep.subr.bf16.mxu1 %v6071_v15 }
 0x26c   :  { %5682 = vmatpush3.bf16.msra.mxu1 %v6072_v52 }
 0x26d   :  { %5683 = vmatprep.subr.bf16.mxu1 %v6073_v20 }
 0x270   :  { %5684 = vmatpush3.bf16.msra.mxu1 %v6074_v14 }
 0x271   :  { %5685 = vmatprep.subr.bf16.mxu1 %v6075_v26 }
 0x274   :  { %5686 = vmatpush3.bf16.msra.mxu1 %v6076_v23  ;;  %v6091_v23 = vld [vmem:[%s7956_s5 + $0x10] sm:$0xff]  }
 0x275   :  { %5687 = vmatprep.subr.bf16.mxu1 %v6077_v4  ;;  %5823 = vmatpush3.bf16.msra.mxu0 %v6091_v23  ;;  %v6092_v4 = vld [vmem:[%s7956_s5 + $0x18] sm:$0xff]  }
 0x276   :  { %5824 = vmatprep.subr.bf16.mxu0 %v6136_v40 }
 0x278   :  { %5688 = vmatpush3.bf16.msra.mxu1 %v6078_v47  ;;  %v6097_v47 = vld [vmem:[%s7958_s7] sm:$0xff]  }
 0x279   :  { %5689 = vmatprep.subr.bf16.mxu1 %v6079_v59  ;;  %5825 = vmatpush3.bf16.msra.mxu0 %v6092_v4  ;;  %v6093_v59 = vld [vmem:[%s7956_s5 + $0x20] sm:$0xff]   ;;  %v6104_v4 = vld [vmem:[%s7958_s7 + $0x38] sm:$0xff]  }
 0x27a   :  { %5826 = vmatprep.subr.bf16.mxu0 %v6136_v40 }
 0x27c   :  { %5690 = vmatpush3.bf16.msra.mxu1 %v6080_v19  ;;  %v6098_v19 = vld [vmem:[%s7958_s7 + $0x8] sm:$0xff]  }
 0x27d   :  { %5798 = vmatprep.subr.bf16.mxu1 %v6136_v40  ;;  %5827 = vmatpush3.bf16.msra.mxu0 %v6093_v59 }
 0x27e   :  { %5828 = vmatprep.subr.bf16.mxu0 %v6136_v40 }
 0x27f   :  { %4660 = vmatmul.mubr.bf16.vlgmr.msra.gmra.mrb[24].mxu1 %v7403_v10  ;;  %v6084_v10 = vld [vmem:[%s7954_s3 + $0x618] sm:$0xff]  }
 0x280   :  { %5799 = vmatpush3.bf16.msra.mxu1 %v6081_v56  ;;  %5814 = vmatprep.mubr.msk.bf16.mxu1 %vm6137_vm1, %v6136_v40  ;;  %v6094_v56 = vld [vmem:[%s7956_s5 + $0x28] sm:$0xff]  }
 0x281   :  { %5800 = vmatprep.subr.bf16.mxu1 %v6136_v40  ;;  %5829 = vmatpush3.bf16.msra.mxu0 %v6094_v56 }
 0x282   :  { %5830 = vmatprep.subr.bf16.mxu0 %v6136_v40 }
 0x284   :  { %5801 = vmatpush3.bf16.msra.mxu1 %v6082_v12 }
 0x285   :  { %5802 = vmatprep.subr.bf16.mxu1 %v6136_v40 }
 0x288   :  { %5803 = vmatpush3.bf16.msra.mxu1 %v6083_v25  ;;  %v6099_v25 = vld [vmem:[%s7958_s7 + $0x10] sm:$0xff]  }
 0x289   :  { %5804 = vmatprep.subr.bf16.mxu1 %v6136_v40 }
 0x28c   :  { %5805 = vmatpush3.bf16.msra.mxu1 %v6084_v10 }
 0x28d   :  { %5806 = vmatprep.subr.bf16.mxu1 %v6136_v40 }
 0x290   :  { %5807 = vmatpush3.bf16.msra.mxu1 %v6085_v42  ;;  %v5471_v44 = vpop.f32.mrb[0].mxu1 }
 0x291   :  { %5808 = vmatprep.subr.bf16.mxu1 %v6136_v40  ;;  %v5472_v33 = vpop.f32.mrb[1].mxu1 }
 0x292   :  { %v5473_v17 = vadd.f32 %v5472_v33, %v5471_v44  ;;  %v5474_v58 = vpop.f32.mrb[2].mxu1  ;;  %v6095_v33 = vld [vmem:[%s7956_s5 + $0x30] sm:$0xff]  }
 0x293   :  { %v5475_v37 = vpop.f32.mrb[3].mxu1  ;;  %v6100_v58 = vld [vmem:[%s7958_s7 + $0x18] sm:$0xff]   ;;  %5831 = vmatpush3.bf16.msra.mxu0 %v6095_v33  ;;  %v5420_v33 = vld [vmem:[%s7959_s8] ss:$0 sm:$0xff] }
 0x294   :  { %5809 = vmatpush3.bf16.msra.mxu1 %v6086_v27  ;;  %v4262_v41 = vadd.f32 %v5473_v17, %v5196_v48  ;;  %5832 = vmatprep.subr.bf16.mxu0 %v6136_v40  ;;  %v6102_v48 = vld [vmem:[%s7958_s7 + $0x28] sm:$0xff]  }
 0x295   :  { %5810 = vmatprep.subr.bf16.mxu1 %v6136_v40 }
 0x298   :  { %5811 = vmatpush3.bf16.msra.mxu1 %v6087_v6 }
 0x299   :  { %5812 = vmatprep.subr.bf16.mxu1 %v6136_v40  ;;  %v5537_v11 = vpop.f32.mrb[36].mxu0 }
 0x29a   :  { %v5538_v16 = vpop.f32.mrb[37].mxu0 }
 0x29b   :  { %v5539_v7 = vadd.f32 %v5538_v16, %v5537_v11  ;;  %v5540_v30 = vpop.f32.mrb[38].mxu0  ;;  %v6101_v16 = vld [vmem:[%s7958_s7 + $0x20] sm:$0xff]  }
 0x29c   :  { %5813 = vmatpush3.bf16.msra.mxu1 %v6088_v28  ;;  %v5541_v46 = vpop.f32.mrb[39].mxu0  ;;  %v6096_v28 = vld [vmem:[%s7956_s5 + $0x38] sm:$0xff]  }
 0x29d   :  { %5838 = vmatprep.subr.bf16.mxu1 %v6136_v40  ;;  %5833 = vmatpush3.bf16.msra.mxu0 %v6096_v28 }
 0x29f   :  { %5815 = vmatmul.mubr.bf16.vlgmr.msra.gmra.mrb[28].mxu1 %v3001_v61 }
 0x2a0   :  { %5854 = vmatprep.mubr.msk.bf16.mxu1 %vm6137_vm1, %v6136_v40  ;;  %5839 = vmatpush3.bf16.msra.mxu1 %v6097_v47  ;;  %v5411_v47 = vld [vmem:[%s7957_s6] ss:$0 sm:$0xff]  ;;  %s6138_s6 = smov [#allocation2]  }
 0x2a1   :  { %5840 = vmatprep.subr.bf16.mxu1 %v6136_v40 }
 0x2a4   :  { %5841 = vmatpush3.bf16.msra.mxu1 %v6098_v19 }
 0x2a5   :  { %5842 = vmatprep.subr.bf16.mxu1 %v6136_v40 }
 0x2a8   :  { %5843 = vmatpush3.bf16.msra.mxu1 %v6099_v25 }
 0x2a9   :  { %5844 = vmatprep.subr.bf16.mxu1 %v6136_v40 }
 0x2ac   :  { %5845 = vmatpush3.bf16.msra.mxu1 %v6100_v58 }
 0x2ad   :  { %5846 = vmatprep.subr.bf16.mxu1 %v6136_v40 }
 0x2b0   :  { %5847 = vmatpush3.bf16.msra.mxu1 %v6101_v16 }
 0x2b1   :  { %5848 = vmatprep.subr.bf16.mxu1 %v6136_v40 }
 0x2b2   :  { %v5493_v13 = vpop.f32.mrb[4].mxu1 }
 0x2b3   :  { %v5494_v2 = vpop.f32.mrb[5].mxu1 }
 0x2b4   :  { %v5495_v8 = vadd.f32 %v5494_v2, %v5493_v13  ;;  %v5496_v63 = vpop.f32.mrb[6].mxu1  ;;  %5849 = vmatpush3.bf16.msra.mxu1 %v6102_v48 }
 0x2b5   :  { %v5497_v50 = vpop.f32.mrb[7].mxu1  ;;  %5850 = vmatprep.subr.bf16.mxu1 %v6136_v40 }
 0x2b6   :  { %v4302_v39 = vadd.f32 %v5495_v8, %v4262_v41 }
 0x2b9   :  { %v5581_v34 = vpop.f32.mrb[40].mxu0 }
 0x2ba   :  { %v5582_v49 = vpop.f32.mrb[41].mxu0 }
 0x2bb   :  { %v5583_v36 = vadd.f32 %v5582_v49, %v5581_v34  ;;  %v5584_v0 = vpop.f32.mrb[42].mxu0 }
 0x2bc   :  { %v5585_v31 = vpop.f32.mrb[43].mxu0 }
 0x2d2   :  { %v5515_v21 = vpop.f32.mrb[8].mxu1 }
 0x2d3   :  { %v5516_v61 = vpop.f32.mrb[9].mxu1 }
 0x2d4   :  { %v5517_v22 = vadd.f32 %v5516_v61, %v5515_v21  ;;  %v5518_v53 = vpop.f32.mrb[10].mxu1 }
 0x2d5   :  { %v5519_v38 = vpop.f32.mrb[11].mxu1 }
 0x2d6   :  { %v4342_v62 = vadd.f32 %v5517_v22, %v4302_v39 }
 0x2d8   :  { %v4382_v51 = vadd.f32 %v5539_v7, %v4342_v62 }
 0x2d9   :  { %v5625_v29 = vpop.f32.mrb[44].mxu0 }
 0x2da   :  { %v5626_v3 = vpop.f32.mrb[45].mxu0 }
 0x2db   :  { %v5627_v18 = vadd.f32 %v5626_v3, %v5625_v29  ;;  %v5628_v24 = vpop.f32.mrb[46].mxu0 }
 0x2dc   :  { %v5629_v55 = vpop.f32.mrb[47].mxu0 }
 0x2f2   :  { %v5559_v32 = vpop.f32.mrb[12].mxu1 }
 0x2f3   :  { %v5560_v5 = vpop.f32.mrb[13].mxu1 }
 0x2f4   :  { %v5561_v35 = vadd.f32 %v5560_v5, %v5559_v32  ;;  %v5562_v43 = vpop.f32.mrb[14].mxu1 }
 0x2f5   :  { %v5563_v57 = vpop.f32.mrb[15].mxu1 }
 0x2f6   :  { %v4422_v9 = vadd.f32 %v5561_v35, %v4382_v51 }
 0x2f8   :  { %v4462_v1 = vadd.f32 %v5583_v36, %v4422_v9 }
 0x2f9   :  { %v5669_v15 = vpop.f32.mrb[48].mxu0 }
 0x2fa   :  { %v5670_v52 = vpop.f32.mrb[49].mxu0 }
 0x2fb   :  { %v5671_v20 = vadd.f32 %v5670_v52, %v5669_v15  ;;  %v5672_v14 = vpop.f32.mrb[50].mxu0 }
 0x2fc   :  { %v5673_v26 = vpop.f32.mrb[51].mxu0 }
 0x312   :  { %v5603_v12 = vpop.f32.mrb[16].mxu1 }
 0x313   :  { %v5604_v10 = vpop.f32.mrb[17].mxu1 }
 0x314   :  { %v5605_v42 = vadd.f32 %v5604_v10, %v5603_v12  ;;  %v5606_v27 = vpop.f32.mrb[18].mxu1 }
 0x315   :  { %v5607_v44 = vpop.f32.mrb[19].mxu1  ;;  %v8129_v27 = vlaneseq }
 0x316   :  { %v4502_v17 = vadd.f32 %v5605_v42, %v4462_v1 }
 0x317   :  { %v5018_v44 = vand.u32 127, %v8129_v27 }
 0x318   :  { %v4542_v6 = vadd.f32 %v5627_v18, %v4502_v17 }
 0x319   :  { %v5713_v37 = vpop.f32.mrb[52].mxu0  ;;  %vm5019_vm2 = vcmp.lt.s32.totalorder %v5018_v44, 10 }
 0x31a   :  { %v5714_v11 = vpop.f32.mrb[53].mxu0 }
 0x31b   :  { %v5715_v7 = vadd.f32 %v5714_v11, %v5713_v37  ;;  %v5716_v30 = vpop.f32.mrb[54].mxu0 }
 0x31c   :  { %v5717_v46 = vpop.f32.mrb[55].mxu0 }
 0x332   :  { %v5647_v13 = vpop.f32.mrb[20].mxu1 }
 0x333   :  { %v5648_v2 = vpop.f32.mrb[21].mxu1 }
 0x334   :  { %v5649_v41 = vadd.f32 %v5648_v2, %v5647_v13  ;;  %v5650_v8 = vpop.f32.mrb[22].mxu1 }
 0x335   :  { %v5651_v63 = vpop.f32.mrb[23].mxu1 }
 0x336   :  { %v4582_v50 = vadd.f32 %v5649_v41, %v4542_v6 }
 0x338   :  { %v4622_v39 = vadd.f32 %v5671_v20, %v4582_v50 }
 0x352   :  { %v5691_v34 = vpop.f32.mrb[24].mxu1 }
 0x353   :  { %v5692_v49 = vpop.f32.mrb[25].mxu1 }
 0x354   :  { %v5693_v36 = vadd.f32 %v5692_v49, %v5691_v34  ;;  %v5694_v0 = vpop.f32.mrb[26].mxu1 }
 0x355   :  { %v5695_v31 = vpop.f32.mrb[27].mxu1 }
 0x356   :  { %v4662_v21 = vadd.f32 %v5693_v36, %v4622_v39 }
 0x358   :  { %v4702_v61 = vadd.f32 %v5715_v7, %v4662_v21 }
 0x372   :  { %v4741_v22 = vpop.f32.mrb[28].mxu1 }
 0x373   :  { %v4742_v53 = vadd.f32 %v4741_v22, %v4702_v61  ;;  %v5816_v38 = vpop.f32.mrb[29].mxu1 }
 0x374   :  { %v4744_v62 = vpop.f32.mrb[30].mxu1 }
 0x375   :  { %v4748_v54 = vcombine.high %v4742_v53, %v4742_v53  ;;  %v4755_v51 = vrot.slane %v4742_v53, %v6293_v45  ;;  %v5817_v60 = vpop.f32.mrb[31].mxu1 }
 0x377   :  { %v4762_v29 = vrot.slane %v4748_v54, %v6293_v45  ;;  %v4763_v3 = vcombine.high %v4755_v51, %v4755_v51  ;;  %v6103_v45 = vld [vmem:[%s7958_s7 + $0x30] sm:$0xff]   ;;  %s5041_s7 = sshll.u32 %s6138_s6, 4  ;;  %s5042_s7 = int_to_ptr.vmem [resolvable:$true] %s5041_s7 }
 0x378   :  { %5851 = vmatpush3.bf16.msra.mxu1 %v6103_v45  ;;  %s6110_s8 = scalar_lea.vmem %s5042_s7, 32  ;;  %p6115_p1 = scmp.lt.s32.totalorder %s5042_s7, %s5042_s7 }
 0x379   :  { %v4764_v18 = vcombine.high %v4762_v29, %v4762_v29  ;;  %v4769_v24 = vmax.f32 %v4755_v51, %v4763_v3  ;;  %5852 = vmatprep.subr.bf16.mxu1 %v6136_v40  ;;  %p6111_p0 = scmp.ne.s32.totalorder %s5042_s7, %s6110_s8  ;;  %p6116_p2 = scmp.lt.s32.totalorder %s6110_s8, %s6110_s8 }
 0x37b   :  { %v4770_v55 = vmax.f32 %v4762_v29, %v4764_v18  ;;  %v5409_v32 = vrot.slane %v4769_v24, 9  ;;  %p6117_p3 = por %p6116_p2, %p6115_p1 }
 0x37c   :  { %5853 = vmatpush3.bf16.msra.mxu1 %v6104_v4 }
 0x37d   :  { %v5410_v5 = vrot.slane %v4770_v55, 9  ;;  %v4779_v35 = vmax.f32 %v4769_v24, %v5409_v32  ;;  %p6118_p4 = pnand %p6117_p3, %p6111_p0 }
 0x37f   :  { %v4780_v43 = vmax.f32 %v4770_v55, %v5410_v5  ;;  %v4781_v57 = vmax.f32 %v4779_v35, 0.0 }
 0x381   :  { %v4782_v9 = vmax.f32 %v4780_v43, 0.0  ;;  %v4783_v1 = vpack.c.bf16 %v4781_v57, %v4781_v57 }
 0x383   :  { %v4784_v15 = vpack.c.bf16 %v4782_v9, %v4782_v9  ;;  %v4810_v20 = vunpack.c.l.b16 %v4783_v1 }
 0x385   :  { %v4811_v52 = vunpack.c.l.b16 %v4784_v15 }
 0x387   :  { %v4812_v14 = vrot.slane %v4811_v52, 7 }
 0x389   :  { %v4813_v26 = vsel %vm1447_vm0, %v4812_v14, %v4810_v20 }
 0x38a   :  { %v4814_v23 = vpack.c.b16 %v4813_v26, %v4813_v26 }
 0x38c   :  { %5835 = vmatmul.mubr.bf16.vlgmr.msra.gmra.mrb[56].mxu0 %v4814_v23 }
 0x45f   :  { %v4898_v59 = vpop.f32.mrb[56].mxu0 }
 0x460   :  { %v4899_v19 = vadd.f32 %v5411_v47, %v4898_v59  ;;  %v5836_v56 = vpop.f32.mrb[57].mxu0 }
 0x461   :  { %v4901_v12 = vpop.f32.mrb[58].mxu0 }
 0x462   :  { %v4904_v25 = vmax.f32 %v4899_v19, 0.0  ;;  %v5837_v10 = vpop.f32.mrb[59].mxu0 }
 0x464   :  { %v4905_v42 = vpack.c.bf16 %v4904_v25, %v4904_v25 }
 0x466   :  { %5855 = vmatmul.mubr.bf16.vlgmr.msra.gmra.mrb[32].mxu1 %v4905_v42 }
 0x539   :  { %v5011_v40 = vpop.f32.mrb[32].mxu1 }
 0x53a   :  { %v5012_v17 = vadd.f32 %v5420_v33, %v5011_v40  ;;  %v5856_v58 = vpop.f32.mrb[33].mxu1 }
 0x53b   :  { %v5014_v6 = vpop.f32.mrb[34].mxu1 }
 0x53c   :  { %v5857_v37 = vpop.f32.mrb[35].mxu1  ;;  %v5020_v28 = vsel %vm5019_vm2, %v5012_v17, -inf }
 0x53d   :  { %v5022_v11 = vsel %vm5021_vm3, %v5020_v28, -inf }
 0x53e   :  { %5023 = vmax.xlane.f32.xlu0 %v5022_v11 }
 0x5cb   :  { %v5024_v16 = vpop.xlane.xlu0 %5023 }
 0x5cc   :  { %v5025_v7 = vsub.f32 %v5020_v28, %v5024_v16 }
 0x5ce   :  { %v5026_v30 = vmul.f32 1.442695, %v5025_v7 }
 0x5d0   :  { %6105 = vpow2.f32 %v5026_v30 }
 0x5da   :  { %v6106_v46 = vpop.eup %6105 }
 0x5db   :  { %v5028_v48 = vsel %vm5021_vm3, %v6106_v46, 0.0 }
 0x5dc   :  { %5029 = vadd.xlane.f32.xlu0 %v5028_v48 }
 0x669   :  { %v5030_v13 = vpop.xlane.xlu0 %5029 }
 0x66a   :  { %6107 = vlog2.f32 %v5030_v13 }
 0x674   :  { %v6108_v2 = vpop.eup %6107 }
 0x675   :  { %v5032_v41 = vmul.f32 0.6931472, %v6108_v2 }
 0x677   :  { %v5033_v8 = vsub.f32 %v5025_v7, %v5032_v41 }
 0x679   :  { %5034 = vst [vmem:[#allocation2] sm:$0x3] %v5033_v8 }
 0x67a   :  { %6121 = shalt.err (!%p6118_p4)
}
 0x67b   :  { %s6122_s25 = scalar_lea.hbm %s7960_s9, 32 }
 0x67c   :  { %p6123_p5 = scmp.ne.s32.totalorder %s7960_s9, %s6122_s25  ;;  %p6126_p6 = scmp.lt.u32.totalorder %s6122_s25, %s7960_s9 }
 0x67e   :  { %p6128_p7 = pnand %p6126_p6, %p6123_p5 }
 0x680   :  { %6131 = shalt.err (!%p6128_p7)
}
 0x681   :  { %5044 = dma.vmem_to_hbm [thread:$0]  %s5042_s7, 32, %s7960_s9, [#allocation3]  }
 0x682   :  { %6132 = dma.done.wait [#allocation3], 32  }
 0x683   :  { %6133 = vsyncadd [#allocation3], 4294967264 }
 0x684   :  { %5048 = vsyncpa [#allocation3], 1 }

</bundles_post_ra>
